<compile_context>
chip_gen: v6e
topology: v6e:2x2x1
jax: 0.10.0
libtpu: 0.0.40
codegen_flags: <defaults>
</compile_context>

<pallas_src>
import functools

import jax
import jax.numpy as jnp
from jax import lax
from jax.experimental import pallas as pl
from jax.experimental.pallas import tpu as pltpu

HIDDEN = 64      # fixed by the module (nn.LSTM hidden_size=64)
LANE = 128
SUBLANE = 8


def _reorder_gates(w):
    """Reorder gate column blocks from PyTorch order [i,f,g,o] to [i,f,o,g]."""
    n = w.shape[-1] // 4
    return jnp.concatenate([w[:, :2 * n], w[:, 3 * n:], w[:, 2 * n:3 * n]], axis=-1)


def riae_kernel(xp_ref, x_ref, whe_ref, wdec_ref, bd_ref, out_ref, hh_ref,
                *, seq_len, in_ch, b_tile, unroll):
    H = HIDDEN
    C = in_ch

    whe = whe_ref[...]                                            # (H, 4H)
    wdec = wdec_ref[...]                                          # (HC_PAD, 4C), zero-padded rows
    bd_b = jnp.broadcast_to(bd_ref[...], (b_tile, 4 * C))         # hoisted bias broadcast
    inv_c = jnp.float32(1.0 / C)
    lane_t = lax.broadcasted_iota(jnp.int32, (b_tile, seq_len), 1)

    # Zero the staging buffer once so the padded tail never contributes NaN/junk.
    hh_ref[...] = jnp.zeros_like(hh_ref)

    def step(t, carry):
        h_e, c_e, h_d, c_d, scores = carry

        # ---- encoder cell: input projection (incl. bias) precomputed -> xp_ref[t]
        gates_e = xp_ref[t] + jnp.dot(h_e, whe, preferred_element_type=jnp.float32)
        sig_e = jax.nn.sigmoid(gates_e[:, :3 * H])                # [i | f | o]
        g_e = jnp.tanh(gates_e[:, 3 * H:])                        # [g]
        i_e = sig_e[:, :H]
        f_e = sig_e[:, H:2 * H]
        o_e = sig_e[:, 2 * H:]
        c_e = f_e * c_e + i_e * g_e
        h_e = o_e * jnp.tanh(c_e)

        # ---- decoder cell: single fused matmul [h_e, h_d] @ [W_ih; W_hh]
        hh_ref[:, :H] = h_e
        hh_ref[:, H:H + C] = h_d
        gates_d = jnp.dot(hh_ref[...], wdec,
                          preferred_element_type=jnp.float32) + bd_b
        sig_d = jax.nn.sigmoid(gates_d[:, :3 * C])                # [i | f | o]
        g_d = jnp.tanh(gates_d[:, 3 * C:])                        # [g]
        i_d = sig_d[:, :C]
        f_d = sig_d[:, C:2 * C]
        o_d = sig_d[:, 2 * C:]
        c_d = f_d * c_d + i_d * g_d
        h_d = o_d * jnp.tanh(c_d)

        # ---- per-step score = mean((h_d - x_t)^2, -1); stash in lane t of (B, T)
        err = h_d - x_ref[t]
        sc = jnp.sum(err * err, axis=-1, keepdims=True) * inv_c   # (B, 1)
        scores = jnp.where(lane_t == t, sc, scores)
        return h_e, c_e, h_d, c_d, scores

    zH = jnp.zeros((b_tile, H), jnp.float32)
    zC = jnp.zeros((b_tile, C), jnp.float32)
    z_sc = jnp.zeros((b_tile, seq_len), jnp.float32)
    carry = lax.fori_loop(0, seq_len, step, (zH, zH, zC, zC, z_sc), unroll=unroll)

    out_ref[...] = carry[4]                                       # lane-dense (B_tile, T)


def riae_forward(x, params):
    """x: (B, T, C) float32, returns per-point anomaly scores (B, T)."""
    B, T, C = x.shape
    H = HIDDEN

    # Pad batch to a multiple of the f32 sublane height and pick a batch tile.
    b_pad = max(SUBLANE, ((B + SUBLANE - 1) // SUBLANE) * SUBLANE)
    b_tile = min(b_pad, 128)
    b_pad = ((b_pad + b_tile - 1) // b_tile) * b_tile
    hc_pad = ((H + C + LANE - 1) // LANE) * LANE

    x_tbc = jnp.transpose(x.astype(jnp.float32), (1, 0, 2))       # (T, B, C) time-major
    if b_pad != B:
        x_tbc = jnp.pad(x_tbc, ((0, 0), (0, b_pad - B), (0, 0)))

    # Present weights as x @ W layouts; gate columns reordered to [i, f, o, g].
    wie = _reorder_gates(params["w_ih_enc"].T.astype(jnp.float32))            # (C, 4H)
    whe = _reorder_gates(params["w_hh_enc"].T.astype(jnp.float32))            # (H, 4H)
    be = _reorder_gates(
        (params["b_ih_enc"] + params["b_hh_enc"]).reshape(1, -1).astype(jnp.float32))
    wid = _reorder_gates(params["w_ih_dec"].T.astype(jnp.float32))            # (H, 4C)
    whd = _reorder_gates(params["w_hh_dec"].T.astype(jnp.float32))            # (C, 4C)
    bd = _reorder_gates(
        (params["b_ih_dec"] + params["b_hh_dec"]).reshape(1, -1).astype(jnp.float32))

    # Fused decoder weight [W_ih; W_hh], rows zero-padded up to a full lane tile.
    wdec = jnp.concatenate([wid, whd], axis=0)                                # (H+C, 4C)
    wdec = jnp.pad(wdec, ((0, hc_pad - (H + C)), (0, 0)))

    # Encoder input projection for ALL timesteps as one big matmul (bias folded in).
    xproj = jnp.einsum("tbc,ch->tbh", x_tbc, wie,
                       precision=lax.Precision.HIGHEST) + be                  # (T, b_pad, 4H)

    grid = (b_pad // b_tile,)
    kernel = functools.partial(riae_kernel, seq_len=T, in_ch=C, b_tile=b_tile,
                               unroll=(True if T <= 16 else 8))
    out = pl.pallas_call(
        kernel,
        out_shape=jax.ShapeDtypeStruct((b_pad, T), jnp.float32),
        grid=grid,
        in_specs=[
            pl.BlockSpec((T, b_tile, 4 * H), lambda b: (0, b, 0)),   # xproj
            pl.BlockSpec((T, b_tile, C), lambda b: (0, b, 0)),       # x (time-major)
            pl.BlockSpec((H, 4 * H), lambda b: (0, 0)),              # encoder W_hh
            pl.BlockSpec((hc_pad, 4 * C), lambda b: (0, 0)),         # fused decoder W
            pl.BlockSpec((1, 4 * C), lambda b: (0, 0)),              # decoder bias
        ],
        out_specs=pl.BlockSpec((b_tile, T), lambda b: (b, 0)),
        scratch_shapes=[pltpu.VMEM((b_tile, hc_pad), jnp.float32)],  # [h_e | h_d] staging
        compiler_params=pltpu.CompilerParams(
            dimension_semantics=("parallel",)),
    )(xproj, x_tbc, whe, wdec, bd)
    return out[:B]                                                   # (B, T)


# ------------------------- plain-JAX reference -------------------------

def _lstm_ref(x, w_ih, w_hh, b_ih, b_hh):
    B, T, _ = x.shape
    H = w_hh.shape[1]

    def step(carry, x_t):
        h, c = carry
        gates = x_t @ w_ih.T + b_ih + h @ w_hh.T + b_hh
        i, f, g, o = jnp.split(gates, 4, axis=-1)
        i = jax.nn.sigmoid(i)
        f = jax.nn.sigmoid(f)
        g = jnp.tanh(g)
        o = jax.nn.sigmoid(o)
        c = f * c + i * g
        h = o * jnp.tanh(c)
        return (h, c), h

    init = (jnp.zeros((B, H), jnp.float32), jnp.zeros((B, H), jnp.float32))
    _, ys = lax.scan(step, init, jnp.transpose(x, (1, 0, 2)))
    return jnp.transpose(ys, (1, 0, 2))


def riae_forward_ref(x, p):
    enc = _lstm_ref(x, p["w_ih_enc"], p["w_hh_enc"], p["b_ih_enc"], p["b_hh_enc"])
    out = _lstm_ref(enc, p["w_ih_dec"], p["w_hh_dec"], p["b_ih_dec"], p["b_hh_dec"])
    return jnp.mean((out - x) ** 2, axis=-1)


# ------------------------------ driver ---------------------------------

def init_params(key, in_ch):
    ks = jax.random.split(key, 8)
    k_enc = 1.0 / jnp.sqrt(HIDDEN)
    k_dec = 1.0 / jnp.sqrt(in_ch)
    u = lambda k, shape, s: jax.random.uniform(k, shape, jnp.float32, -s, s)
    return {
        # encoder: nn.LSTM(input_size=in_ch, hidden_size=64)
        "w_ih_enc": u(ks[0], (4 * HIDDEN, in_ch), k_enc),
        "w_hh_enc": u(ks[1], (4 * HIDDEN, HIDDEN), k_enc),
        "b_ih_enc": u(ks[2], (4 * HIDDEN,), k_enc),
        "b_hh_enc": u(ks[3], (4 * HIDDEN,), k_enc),
        # decoder: nn.LSTM(input_size=64, hidden_size=in_ch)
        "w_ih_dec": u(ks[4], (4 * in_ch, HIDDEN), k_dec),
        "w_hh_dec": u(ks[5], (4 * in_ch, in_ch), k_dec),
        "b_ih_dec": u(ks[6], (4 * in_ch,), k_dec),
        "b_hh_dec": u(ks[7], (4 * in_ch,), k_dec),
    }


if __name__ == "__main__":
    key = jax.random.PRNGKey(0)
    k_x, k_p = jax.random.split(key)

    B, T, C = 2, 8, 4                       # batch, sequence length, input_channel
    x = jax.random.normal(k_x, (B, T, C), jnp.float32)
    params = init_params(k_p, C)

    scores = riae_forward(x, params)        # (B, T) anomaly score per point
    scores = jax.block_until_ready(scores)

    ref = riae_forward_ref(x, params)
    assert scores.shape == (B, T)
    assert jnp.allclose(scores, ref, atol=2e-3, rtol=1e-3), (
        f"mismatch: max abs err {jnp.max(jnp.abs(scores - ref))}")

    print("KERNEL_OK")
</pallas_src>

<mosaic_0001>
module attributes {stable_mosaic.version = 11 : i64} {
  func.func @riae_kernel(%arg0: i32, %arg1: memref<8x8x256xf32, #tpu.memory_space<vmem>>, %arg2: memref<8x8x4xf32, #tpu.memory_space<vmem>>, %arg3: memref<64x256xf32, #tpu.memory_space<vmem>>, %arg4: memref<128x16xf32, #tpu.memory_space<vmem>>, %arg5: memref<1x16xf32, #tpu.memory_space<vmem>>, %arg6: memref<8x8xf32, #tpu.memory_space<vmem>>, %arg7: memref<8x128xf32, #tpu.memory_space<vmem>>) attributes {dimension_semantics = [#tpu.dimension_semantics<parallel>], iteration_bounds = array<i64: 1>, scalar_prefetch = 0 : i64, scratch_operands = 1 : i64, tpu.core_type = #tpu.core_type<tc>, window_params = [{transform_indices = @transform_0, window_bounds = array<i64: 8, 8, 256>}, {transform_indices = @transform_1, window_bounds = array<i64: 8, 8, 4>}, {pipeline_mode = #tpu.pipeline_mode<synchronous>, transform_indices = @transform_2, window_bounds = array<i64: 64, 256>}, {pipeline_mode = #tpu.pipeline_mode<synchronous>, transform_indices = @transform_3, window_bounds = array<i64: 128, 16>}, {pipeline_mode = #tpu.pipeline_mode<synchronous>, transform_indices = @transform_4, window_bounds = array<i64: 1, 16>}, {transform_indices = @transform_5, window_bounds = array<i64: 8, 8>}]} {
    %c0 = arith.constant 0 : index
    %c0_0 = arith.constant 0 : index
    %0 = vector.load %arg3[%c0, %c0_0] : memref<64x256xf32, #tpu.memory_space<vmem>>, vector<64x256xf32>
    %c0_1 = arith.constant 0 : index
    %c0_2 = arith.constant 0 : index
    %1 = vector.load %arg4[%c0_1, %c0_2] : memref<128x16xf32, #tpu.memory_space<vmem>>, vector<128x16xf32>
    %c0_3 = arith.constant 0 : index
    %c0_4 = arith.constant 0 : index
    %2 = vector.load %arg5[%c0_3, %c0_4] : memref<1x16xf32, #tpu.memory_space<vmem>>, vector<1x16xf32>
    %3 = vector.shape_cast %2 : vector<1x16xf32> to vector<1x16xf32>
    %4 = vector.broadcast %3 : vector<1x16xf32> to vector<8x16xf32>
    %5 = tpu.iota {dimensions = array<i32: 1>} : vector<8x8xi32>
    %cst = arith.constant 0.000000e+00 : f32
    %6 = vector.broadcast %cst : f32 to vector<8x128xf32>
    %c0_5 = arith.constant 0 : index
    %c0_6 = arith.constant 0 : index
    %7 = vector.load %arg7[%c0_5, %c0_6] : memref<8x128xf32, #tpu.memory_space<vmem>>, vector<8x128xf32>
    tpu.vector_store %arg7[%c0_5, %c0_6], %6 {strides = array<i32>} : memref<8x128xf32, #tpu.memory_space<vmem>>, vector<8x128xf32>,
    %cst_7 = arith.constant 0.000000e+00 : f32
    %8 = vector.broadcast %cst_7 : f32 to vector<8x64xf32>
    %cst_8 = arith.constant 0.000000e+00 : f32
    %9 = vector.broadcast %cst_8 : f32 to vector<8x4xf32>
    %cst_9 = arith.constant 0.000000e+00 : f32
    %10 = vector.broadcast %cst_9 : f32 to vector<8x8xf32>
    %cst_10 = arith.constant 2.500000e-01 : f32
    %c0_i32 = arith.constant 0 : i32
    %11 = arith.index_cast %c0_i32 : i32 to index
    %c0_11 = arith.constant 0 : index
    %c0_12 = arith.constant 0 : index
    %12 = vector.load %arg1[%11, %c0_11, %c0_12] : memref<8x8x256xf32, #tpu.memory_space<vmem>>, vector<1x8x256xf32>
    %13 = vector.shape_cast %12 : vector<1x8x256xf32> to vector<8x256xf32>
    %cst_13 = arith.constant dense<0.000000e+00> : vector<8x256xf32>
    %14 = tpu.matmul %8, %0, %cst_13 {dimension_numbers = #tpu.dot_dimension_numbers<[1], [0], [0], [1], [0, 0, 1, 1], [], []>} : vector<8x64xf32>, vector<64x256xf32>, vector<8x256xf32> -> vector<8x256xf32>
    %15 = arith.addf %13, %14 : vector<8x256xf32>
    %16 = vector.extract_strided_slice %15 {offsets = [0, 0], sizes = [8, 192], strides = [1, 1]} : vector<8x256xf32> to vector<8x192xf32>
    %17 = arith.negf %16 : vector<8x192xf32>
    %18 = math.exp %17 : vector<8x192xf32>
    %cst_14 = arith.constant 1.000000e+00 : f32
    %19 = vector.broadcast %cst_14 : f32 to vector<8x192xf32>
    %20 = arith.addf %19, %18 : vector<8x192xf32>
    %21 = arith.divf %19, %20 : vector<8x192xf32>
    %22 = vector.extract_strided_slice %15 {offsets = [0, 192], sizes = [8, 64], strides = [1, 1]} : vector<8x256xf32> to vector<8x64xf32>
    %23 = math.tanh %22 : vector<8x64xf32>
    %24 = vector.extract_strided_slice %21 {offsets = [0, 0], sizes = [8, 64], strides = [1, 1]} : vector<8x192xf32> to vector<8x64xf32>
    %25 = vector.extract_strided_slice %21 {offsets = [0, 64], sizes = [8, 64], strides = [1, 1]} : vector<8x192xf32> to vector<8x64xf32>
    %26 = vector.extract_strided_slice %21 {offsets = [0, 128], sizes = [8, 64], strides = [1, 1]} : vector<8x192xf32> to vector<8x64xf32>
    %27 = arith.mulf %25, %8 : vector<8x64xf32>
    %28 = arith.mulf %24, %23 : vector<8x64xf32>
    %29 = arith.addf %27, %28 : vector<8x64xf32>
    %30 = math.tanh %29 : vector<8x64xf32>
    %31 = arith.mulf %26, %30 : vector<8x64xf32>
    %c0_15 = arith.constant 0 : index
    %c0_16 = arith.constant 0 : index
    %32 = vector.load %arg7[%c0_15, %c0_16] : memref<8x128xf32, #tpu.memory_space<vmem>>, vector<8x64xf32>
    tpu.vector_store %arg7[%c0_15, %c0_16], %31 {strides = array<i32>} : memref<8x128xf32, #tpu.memory_space<vmem>>, vector<8x64xf32>,
    %c0_17 = arith.constant 0 : index
    %c64 = arith.constant 64 : index
    %33 = vector.load %arg7[%c0_17, %c64] : memref<8x128xf32, #tpu.memory_space<vmem>>, vector<8x4xf32>
    tpu.vector_store %arg7[%c0_17, %c64], %9 {strides = array<i32>} : memref<8x128xf32, #tpu.memory_space<vmem>>, vector<8x4xf32>,
    %c0_18 = arith.constant 0 : index
    %c0_19 = arith.constant 0 : index
    %34 = vector.load %arg7[%c0_18, %c0_19] : memref<8x128xf32, #tpu.memory_space<vmem>>, vector<8x128xf32>
    %cst_20 = arith.constant dense<0.000000e+00> : vector<8x16xf32>
    %35 = tpu.matmul %34, %1, %cst_20 {dimension_numbers = #tpu.dot_dimension_numbers<[1], [0], [0], [1], [0, 0, 1, 1], [], []>} : vector<8x128xf32>, vector<128x16xf32>, vector<8x16xf32> -> vector<8x16xf32>
    %36 = arith.addf %35, %4 : vector<8x16xf32>
    %37 = vector.extract_strided_slice %36 {offsets = [0, 0], sizes = [8, 12], strides = [1, 1]} : vector<8x16xf32> to vector<8x12xf32>
    %38 = arith.negf %37 : vector<8x12xf32>
    %39 = math.exp %38 : vector<8x12xf32>
    %cst_21 = arith.constant 1.000000e+00 : f32
    %40 = vector.broadcast %cst_21 : f32 to vector<8x12xf32>
    %41 = arith.addf %40, %39 : vector<8x12xf32>
    %42 = arith.divf %40, %41 : vector<8x12xf32>
    %43 = vector.extract_strided_slice %36 {offsets = [0, 12], sizes = [8, 4], strides = [1, 1]} : vector<8x16xf32> to vector<8x4xf32>
    %44 = math.tanh %43 : vector<8x4xf32>
    %45 = vector.extract_strided_slice %42 {offsets = [0, 0], sizes = [8, 4], strides = [1, 1]} : vector<8x12xf32> to vector<8x4xf32>
    %46 = vector.extract_strided_slice %42 {offsets = [0, 4], sizes = [8, 4], strides = [1, 1]} : vector<8x12xf32> to vector<8x4xf32>
    %47 = vector.extract_strided_slice %42 {offsets = [0, 8], sizes = [8, 4], strides = [1, 1]} : vector<8x12xf32> to vector<8x4xf32>
    %48 = arith.mulf %46, %9 : vector<8x4xf32>
    %49 = arith.mulf %45, %44 : vector<8x4xf32>
    %50 = arith.addf %48, %49 : vector<8x4xf32>
    %51 = math.tanh %50 : vector<8x4xf32>
    %52 = arith.mulf %47, %51 : vector<8x4xf32>
    %53 = arith.index_cast %c0_i32 : i32 to index
    %c0_22 = arith.constant 0 : index
    %c0_23 = arith.constant 0 : index
    %54 = vector.load %arg2[%53, %c0_22, %c0_23] : memref<8x8x4xf32, #tpu.memory_space<vmem>>, vector<1x8x4xf32>
    %55 = vector.shape_cast %54 : vector<1x8x4xf32> to vector<8x4xf32>
    %56 = arith.subf %52, %55 : vector<8x4xf32>
    %57 = arith.mulf %56, %56 : vector<8x4xf32>
    %cst_24 = arith.constant dense<0.000000e+00> : vector<8xf32>
    %58 = vector.multi_reduction <add>, %57, %cst_24 [1] : vector<8x4xf32> to vector<8xf32>
    %59 = vector.shape_cast %58 : vector<8xf32> to vector<8x1xf32>
    %60 = vector.broadcast %cst_10 : f32 to vector<8x1xf32>
    %61 = arith.mulf %59, %60 : vector<8x1xf32>
    %62 = vector.broadcast %c0_i32 : i32 to vector<8x8xi32>
    %63 = arith.cmpi eq, %5, %62 : vector<8x8xi32>
    %64 = vector.shape_cast %61 : vector<8x1xf32> to vector<8x1xf32>
    %65 = vector.broadcast %64 : vector<8x1xf32> to vector<8x8xf32>
    %66 = arith.select %63, %65, %10 : vector<8x8xi1>, vector<8x8xf32>
    %c1_i32 = arith.constant 1 : i32
    %67 = arith.index_cast %c1_i32 : i32 to index
    %c0_25 = arith.constant 0 : index
    %c0_26 = arith.constant 0 : index
    %68 = vector.load %arg1[%67, %c0_25, %c0_26] : memref<8x8x256xf32, #tpu.memory_space<vmem>>, vector<1x8x256xf32>
    %69 = vector.shape_cast %68 : vector<1x8x256xf32> to vector<8x256xf32>
    %cst_27 = arith.constant dense<0.000000e+00> : vector<8x256xf32>
    %70 = tpu.matmul %31, %0, %cst_27 {dimension_numbers = #tpu.dot_dimension_numbers<[1], [0], [0], [1], [0, 0, 1, 1], [], []>} : vector<8x64xf32>, vector<64x256xf32>, vector<8x256xf32> -> vector<8x256xf32>
    %71 = arith.addf %69, %70 : vector<8x256xf32>
    %72 = vector.extract_strided_slice %71 {offsets = [0, 0], sizes = [8, 192], strides = [1, 1]} : vector<8x256xf32> to vector<8x192xf32>
    %73 = arith.negf %72 : vector<8x192xf32>
    %74 = math.exp %73 : vector<8x192xf32>
    %cst_28 = arith.constant 1.000000e+00 : f32
    %75 = vector.broadcast %cst_28 : f32 to vector<8x192xf32>
    %76 = arith.addf %75, %74 : vector<8x192xf32>
    %77 = arith.divf %75, %76 : vector<8x192xf32>
    %78 = vector.extract_strided_slice %71 {offsets = [0, 192], sizes = [8, 64], strides = [1, 1]} : vector<8x256xf32> to vector<8x64xf32>
    %79 = math.tanh %78 : vector<8x64xf32>
    %80 = vector.extract_strided_slice %77 {offsets = [0, 0], sizes = [8, 64], strides = [1, 1]} : vector<8x192xf32> to vector<8x64xf32>
    %81 = vector.extract_strided_slice %77 {offsets = [0, 64], sizes = [8, 64], strides = [1, 1]} : vector<8x192xf32> to vector<8x64xf32>
    %82 = vector.extract_strided_slice %77 {offsets = [0, 128], sizes = [8, 64], strides = [1, 1]} : vector<8x192xf32> to vector<8x64xf32>
    %83 = arith.mulf %81, %29 : vector<8x64xf32>
    %84 = arith.mulf %80, %79 : vector<8x64xf32>
    %85 = arith.addf %83, %84 : vector<8x64xf32>
    %86 = math.tanh %85 : vector<8x64xf32>
    %87 = arith.mulf %82, %86 : vector<8x64xf32>
    %c0_29 = arith.constant 0 : index
    %c0_30 = arith.constant 0 : index
    %88 = vector.load %arg7[%c0_29, %c0_30] : memref<8x128xf32, #tpu.memory_space<vmem>>, vector<8x64xf32>
    tpu.vector_store %arg7[%c0_29, %c0_30], %87 {strides = array<i32>} : memref<8x128xf32, #tpu.memory_space<vmem>>, vector<8x64xf32>,
    %c0_31 = arith.constant 0 : index
    %c64_32 = arith.constant 64 : index
    %89 = vector.load %arg7[%c0_31, %c64_32] : memref<8x128xf32, #tpu.memory_space<vmem>>, vector<8x4xf32>
    tpu.vector_store %arg7[%c0_31, %c64_32], %52 {strides = array<i32>} : memref<8x128xf32, #tpu.memory_space<vmem>>, vector<8x4xf32>,
    %c0_33 = arith.constant 0 : index
    %c0_34 = arith.constant 0 : index
    %90 = vector.load %arg7[%c0_33, %c0_34] : memref<8x128xf32, #tpu.memory_space<vmem>>, vector<8x128xf32>
    %cst_35 = arith.constant dense<0.000000e+00> : vector<8x16xf32>
    %91 = tpu.matmul %90, %1, %cst_35 {dimension_numbers = #tpu.dot_dimension_numbers<[1], [0], [0], [1], [0, 0, 1, 1], [], []>} : vector<8x128xf32>, vector<128x16xf32>, vector<8x16xf32> -> vector<8x16xf32>
    %92 = arith.addf %91, %4 : vector<8x16xf32>
    %93 = vector.extract_strided_slice %92 {offsets = [0, 0], sizes = [8, 12], strides = [1, 1]} : vector<8x16xf32> to vector<8x12xf32>
    %94 = arith.negf %93 : vector<8x12xf32>
    %95 = math.exp %94 : vector<8x12xf32>
    %cst_36 = arith.constant 1.000000e+00 : f32
    %96 = vector.broadcast %cst_36 : f32 to vector<8x12xf32>
    %97 = arith.addf %96, %95 : vector<8x12xf32>
    %98 = arith.divf %96, %97 : vector<8x12xf32>
    %99 = vector.extract_strided_slice %92 {offsets = [0, 12], sizes = [8, 4], strides = [1, 1]} : vector<8x16xf32> to vector<8x4xf32>
    %100 = math.tanh %99 : vector<8x4xf32>
    %101 = vector.extract_strided_slice %98 {offsets = [0, 0], sizes = [8, 4], strides = [1, 1]} : vector<8x12xf32> to vector<8x4xf32>
    %102 = vector.extract_strided_slice %98 {offsets = [0, 4], sizes = [8, 4], strides = [1, 1]} : vector<8x12xf32> to vector<8x4xf32>
    %103 = vector.extract_strided_slice %98 {offsets = [0, 8], sizes = [8, 4], strides = [1, 1]} : vector<8x12xf32> to vector<8x4xf32>
    %104 = arith.mulf %102, %50 : vector<8x4xf32>
    %105 = arith.mulf %101, %100 : vector<8x4xf32>
    %106 = arith.addf %104, %105 : vector<8x4xf32>
    %107 = math.tanh %106 : vector<8x4xf32>
    %108 = arith.mulf %103, %107 : vector<8x4xf32>
    %109 = arith.index_cast %c1_i32 : i32 to index
    %c0_37 = arith.constant 0 : index
    %c0_38 = arith.constant 0 : index
    %110 = vector.load %arg2[%109, %c0_37, %c0_38] : memref<8x8x4xf32, #tpu.memory_space<vmem>>, vector<1x8x4xf32>
    %111 = vector.shape_cast %110 : vector<1x8x4xf32> to vector<8x4xf32>
    %112 = arith.subf %108, %111 : vector<8x4xf32>
    %113 = arith.mulf %112, %112 : vector<8x4xf32>
    %cst_39 = arith.constant dense<0.000000e+00> : vector<8xf32>
    %114 = vector.multi_reduction <add>, %113, %cst_39 [1] : vector<8x4xf32> to vector<8xf32>
    %115 = vector.shape_cast %114 : vector<8xf32> to vector<8x1xf32>
    %116 = vector.broadcast %cst_10 : f32 to vector<8x1xf32>
    %117 = arith.mulf %115, %116 : vector<8x1xf32>
    %118 = vector.broadcast %c1_i32 : i32 to vector<8x8xi32>
    %119 = arith.cmpi eq, %5, %118 : vector<8x8xi32>
    %120 = vector.shape_cast %117 : vector<8x1xf32> to vector<8x1xf32>
    %121 = vector.broadcast %120 : vector<8x1xf32> to vector<8x8xf32>
    %122 = arith.select %119, %121, %66 : vector<8x8xi1>, vector<8x8xf32>
    %c2_i32 = arith.constant 2 : i32
    %123 = arith.index_cast %c2_i32 : i32 to index
    %c0_40 = arith.constant 0 : index
    %c0_41 = arith.constant 0 : index
    %124 = vector.load %arg1[%123, %c0_40, %c0_41] : memref<8x8x256xf32, #tpu.memory_space<vmem>>, vector<1x8x256xf32>
    %125 = vector.shape_cast %124 : vector<1x8x256xf32> to vector<8x256xf32>
    %cst_42 = arith.constant dense<0.000000e+00> : vector<8x256xf32>
    %126 = tpu.matmul %87, %0, %cst_42 {dimension_numbers = #tpu.dot_dimension_numbers<[1], [0], [0], [1], [0, 0, 1, 1], [], []>} : vector<8x64xf32>, vector<64x256xf32>, vector<8x256xf32> -> vector<8x256xf32>
    %127 = arith.addf %125, %126 : vector<8x256xf32>
    %128 = vector.extract_strided_slice %127 {offsets = [0, 0], sizes = [8, 192], strides = [1, 1]} : vector<8x256xf32> to vector<8x192xf32>
    %129 = arith.negf %128 : vector<8x192xf32>
    %130 = math.exp %129 : vector<8x192xf32>
    %cst_43 = arith.constant 1.000000e+00 : f32
    %131 = vector.broadcast %cst_43 : f32 to vector<8x192xf32>
    %132 = arith.addf %131, %130 : vector<8x192xf32>
    %133 = arith.divf %131, %132 : vector<8x192xf32>
    %134 = vector.extract_strided_slice %127 {offsets = [0, 192], sizes = [8, 64], strides = [1, 1]} : vector<8x256xf32> to vector<8x64xf32>
    %135 = math.tanh %134 : vector<8x64xf32>
    %136 = vector.extract_strided_slice %133 {offsets = [0, 0], sizes = [8, 64], strides = [1, 1]} : vector<8x192xf32> to vector<8x64xf32>
    %137 = vector.extract_strided_slice %133 {offsets = [0, 64], sizes = [8, 64], strides = [1, 1]} : vector<8x192xf32> to vector<8x64xf32>
    %138 = vector.extract_strided_slice %133 {offsets = [0, 128], sizes = [8, 64], strides = [1, 1]} : vector<8x192xf32> to vector<8x64xf32>
    %139 = arith.mulf %137, %85 : vector<8x64xf32>
    %140 = arith.mulf %136, %135 : vector<8x64xf32>
    %141 = arith.addf %139, %140 : vector<8x64xf32>
    %142 = math.tanh %141 : vector<8x64xf32>
    %143 = arith.mulf %138, %142 : vector<8x64xf32>
    %c0_44 = arith.constant 0 : index
    %c0_45 = arith.constant 0 : index
    %144 = vector.load %arg7[%c0_44, %c0_45] : memref<8x128xf32, #tpu.memory_space<vmem>>, vector<8x64xf32>
    tpu.vector_store %arg7[%c0_44, %c0_45], %143 {strides = array<i32>} : memref<8x128xf32, #tpu.memory_space<vmem>>, vector<8x64xf32>,
    %c0_46 = arith.constant 0 : index
    %c64_47 = arith.constant 64 : index
    %145 = vector.load %arg7[%c0_46, %c64_47] : memref<8x128xf32, #tpu.memory_space<vmem>>, vector<8x4xf32>
    tpu.vector_store %arg7[%c0_46, %c64_47], %108 {strides = array<i32>} : memref<8x128xf32, #tpu.memory_space<vmem>>, vector<8x4xf32>,
    %c0_48 = arith.constant 0 : index
    %c0_49 = arith.constant 0 : index
    %146 = vector.load %arg7[%c0_48, %c0_49] : memref<8x128xf32, #tpu.memory_space<vmem>>, vector<8x128xf32>
    %cst_50 = arith.constant dense<0.000000e+00> : vector<8x16xf32>
    %147 = tpu.matmul %146, %1, %cst_50 {dimension_numbers = #tpu.dot_dimension_numbers<[1], [0], [0], [1], [0, 0, 1, 1], [], []>} : vector<8x128xf32>, vector<128x16xf32>, vector<8x16xf32> -> vector<8x16xf32>
    %148 = arith.addf %147, %4 : vector<8x16xf32>
    %149 = vector.extract_strided_slice %148 {offsets = [0, 0], sizes = [8, 12], strides = [1, 1]} : vector<8x16xf32> to vector<8x12xf32>
    %150 = arith.negf %149 : vector<8x12xf32>
    %151 = math.exp %150 : vector<8x12xf32>
    %cst_51 = arith.constant 1.000000e+00 : f32
    %152 = vector.broadcast %cst_51 : f32 to vector<8x12xf32>
    %153 = arith.addf %152, %151 : vector<8x12xf32>
    %154 = arith.divf %152, %153 : vector<8x12xf32>
    %155 = vector.extract_strided_slice %148 {offsets = [0, 12], sizes = [8, 4], strides = [1, 1]} : vector<8x16xf32> to vector<8x4xf32>
    %156 = math.tanh %155 : vector<8x4xf32>
    %157 = vector.extract_strided_slice %154 {offsets = [0, 0], sizes = [8, 4], strides = [1, 1]} : vector<8x12xf32> to vector<8x4xf32>
    %158 = vector.extract_strided_slice %154 {offsets = [0, 4], sizes = [8, 4], strides = [1, 1]} : vector<8x12xf32> to vector<8x4xf32>
    %159 = vector.extract_strided_slice %154 {offsets = [0, 8], sizes = [8, 4], strides = [1, 1]} : vector<8x12xf32> to vector<8x4xf32>
    %160 = arith.mulf %158, %106 : vector<8x4xf32>
    %161 = arith.mulf %157, %156 : vector<8x4xf32>
    %162 = arith.addf %160, %161 : vector<8x4xf32>
    %163 = math.tanh %162 : vector<8x4xf32>
    %164 = arith.mulf %159, %163 : vector<8x4xf32>
    %165 = arith.index_cast %c2_i32 : i32 to index
    %c0_52 = arith.constant 0 : index
    %c0_53 = arith.constant 0 : index
    %166 = vector.load %arg2[%165, %c0_52, %c0_53] : memref<8x8x4xf32, #tpu.memory_space<vmem>>, vector<1x8x4xf32>
    %167 = vector.shape_cast %166 : vector<1x8x4xf32> to vector<8x4xf32>
    %168 = arith.subf %164, %167 : vector<8x4xf32>
    %169 = arith.mulf %168, %168 : vector<8x4xf32>
    %cst_54 = arith.constant dense<0.000000e+00> : vector<8xf32>
    %170 = vector.multi_reduction <add>, %169, %cst_54 [1] : vector<8x4xf32> to vector<8xf32>
    %171 = vector.shape_cast %170 : vector<8xf32> to vector<8x1xf32>
    %172 = vector.broadcast %cst_10 : f32 to vector<8x1xf32>
    %173 = arith.mulf %171, %172 : vector<8x1xf32>
    %174 = vector.broadcast %c2_i32 : i32 to vector<8x8xi32>
    %175 = arith.cmpi eq, %5, %174 : vector<8x8xi32>
    %176 = vector.shape_cast %173 : vector<8x1xf32> to vector<8x1xf32>
    %177 = vector.broadcast %176 : vector<8x1xf32> to vector<8x8xf32>
    %178 = arith.select %175, %177, %122 : vector<8x8xi1>, vector<8x8xf32>
    %c3_i32 = arith.constant 3 : i32
    %179 = arith.index_cast %c3_i32 : i32 to index
    %c0_55 = arith.constant 0 : index
    %c0_56 = arith.constant 0 : index
    %180 = vector.load %arg1[%179, %c0_55, %c0_56] : memref<8x8x256xf32, #tpu.memory_space<vmem>>, vector<1x8x256xf32>
    %181 = vector.shape_cast %180 : vector<1x8x256xf32> to vector<8x256xf32>
    %cst_57 = arith.constant dense<0.000000e+00> : vector<8x256xf32>
    %182 = tpu.matmul %143, %0, %cst_57 {dimension_numbers = #tpu.dot_dimension_numbers<[1], [0], [0], [1], [0, 0, 1, 1], [], []>} : vector<8x64xf32>, vector<64x256xf32>, vector<8x256xf32> -> vector<8x256xf32>
    %183 = arith.addf %181, %182 : vector<8x256xf32>
    %184 = vector.extract_strided_slice %183 {offsets = [0, 0], sizes = [8, 192], strides = [1, 1]} : vector<8x256xf32> to vector<8x192xf32>
    %185 = arith.negf %184 : vector<8x192xf32>
    %186 = math.exp %185 : vector<8x192xf32>
    %cst_58 = arith.constant 1.000000e+00 : f32
    %187 = vector.broadcast %cst_58 : f32 to vector<8x192xf32>
    %188 = arith.addf %187, %186 : vector<8x192xf32>
    %189 = arith.divf %187, %188 : vector<8x192xf32>
    %190 = vector.extract_strided_slice %183 {offsets = [0, 192], sizes = [8, 64], strides = [1, 1]} : vector<8x256xf32> to vector<8x64xf32>
    %191 = math.tanh %190 : vector<8x64xf32>
    %192 = vector.extract_strided_slice %189 {offsets = [0, 0], sizes = [8, 64], strides = [1, 1]} : vector<8x192xf32> to vector<8x64xf32>
    %193 = vector.extract_strided_slice %189 {offsets = [0, 64], sizes = [8, 64], strides = [1, 1]} : vector<8x192xf32> to vector<8x64xf32>
    %194 = vector.extract_strided_slice %189 {offsets = [0, 128], sizes = [8, 64], strides = [1, 1]} : vector<8x192xf32> to vector<8x64xf32>
    %195 = arith.mulf %193, %141 : vector<8x64xf32>
    %196 = arith.mulf %192, %191 : vector<8x64xf32>
    %197 = arith.addf %195, %196 : vector<8x64xf32>
    %198 = math.tanh %197 : vector<8x64xf32>
    %199 = arith.mulf %194, %198 : vector<8x64xf32>
    %c0_59 = arith.constant 0 : index
    %c0_60 = arith.constant 0 : index
    %200 = vector.load %arg7[%c0_59, %c0_60] : memref<8x128xf32, #tpu.memory_space<vmem>>, vector<8x64xf32>
    tpu.vector_store %arg7[%c0_59, %c0_60], %199 {strides = array<i32>} : memref<8x128xf32, #tpu.memory_space<vmem>>, vector<8x64xf32>,
    %c0_61 = arith.constant 0 : index
    %c64_62 = arith.constant 64 : index
    %201 = vector.load %arg7[%c0_61, %c64_62] : memref<8x128xf32, #tpu.memory_space<vmem>>, vector<8x4xf32>
    tpu.vector_store %arg7[%c0_61, %c64_62], %164 {strides = array<i32>} : memref<8x128xf32, #tpu.memory_space<vmem>>, vector<8x4xf32>,
    %c0_63 = arith.constant 0 : index
    %c0_64 = arith.constant 0 : index
    %202 = vector.load %arg7[%c0_63, %c0_64] : memref<8x128xf32, #tpu.memory_space<vmem>>, vector<8x128xf32>
    %cst_65 = arith.constant dense<0.000000e+00> : vector<8x16xf32>
    %203 = tpu.matmul %202, %1, %cst_65 {dimension_numbers = #tpu.dot_dimension_numbers<[1], [0], [0], [1], [0, 0, 1, 1], [], []>} : vector<8x128xf32>, vector<128x16xf32>, vector<8x16xf32> -> vector<8x16xf32>
    %204 = arith.addf %203, %4 : vector<8x16xf32>
    %205 = vector.extract_strided_slice %204 {offsets = [0, 0], sizes = [8, 12], strides = [1, 1]} : vector<8x16xf32> to vector<8x12xf32>
    %206 = arith.negf %205 : vector<8x12xf32>
    %207 = math.exp %206 : vector<8x12xf32>
    %cst_66 = arith.constant 1.000000e+00 : f32
    %208 = vector.broadcast %cst_66 : f32 to vector<8x12xf32>
    %209 = arith.addf %208, %207 : vector<8x12xf32>
    %210 = arith.divf %208, %209 : vector<8x12xf32>
    %211 = vector.extract_strided_slice %204 {offsets = [0, 12], sizes = [8, 4], strides = [1, 1]} : vector<8x16xf32> to vector<8x4xf32>
    %212 = math.tanh %211 : vector<8x4xf32>
    %213 = vector.extract_strided_slice %210 {offsets = [0, 0], sizes = [8, 4], strides = [1, 1]} : vector<8x12xf32> to vector<8x4xf32>
    %214 = vector.extract_strided_slice %210 {offsets = [0, 4], sizes = [8, 4], strides = [1, 1]} : vector<8x12xf32> to vector<8x4xf32>
    %215 = vector.extract_strided_slice %210 {offsets = [0, 8], sizes = [8, 4], strides = [1, 1]} : vector<8x12xf32> to vector<8x4xf32>
    %216 = arith.mulf %214, %162 : vector<8x4xf32>
    %217 = arith.mulf %213, %212 : vector<8x4xf32>
    %218 = arith.addf %216, %217 : vector<8x4xf32>
    %219 = math.tanh %218 : vector<8x4xf32>
    %220 = arith.mulf %215, %219 : vector<8x4xf32>
    %221 = arith.index_cast %c3_i32 : i32 to index
    %c0_67 = arith.constant 0 : index
    %c0_68 = arith.constant 0 : index
    %222 = vector.load %arg2[%221, %c0_67, %c0_68] : memref<8x8x4xf32, #tpu.memory_space<vmem>>, vector<1x8x4xf32>
    %223 = vector.shape_cast %222 : vector<1x8x4xf32> to vector<8x4xf32>
    %224 = arith.subf %220, %223 : vector<8x4xf32>
    %225 = arith.mulf %224, %224 : vector<8x4xf32>
    %cst_69 = arith.constant dense<0.000000e+00> : vector<8xf32>
    %226 = vector.multi_reduction <add>, %225, %cst_69 [1] : vector<8x4xf32> to vector<8xf32>
    %227 = vector.shape_cast %226 : vector<8xf32> to vector<8x1xf32>
    %228 = vector.broadcast %cst_10 : f32 to vector<8x1xf32>
    %229 = arith.mulf %227, %228 : vector<8x1xf32>
    %230 = vector.broadcast %c3_i32 : i32 to vector<8x8xi32>
    %231 = arith.cmpi eq, %5, %230 : vector<8x8xi32>
    %232 = vector.shape_cast %229 : vector<8x1xf32> to vector<8x1xf32>
    %233 = vector.broadcast %232 : vector<8x1xf32> to vector<8x8xf32>
    %234 = arith.select %231, %233, %178 : vector<8x8xi1>, vector<8x8xf32>
    %c4_i32 = arith.constant 4 : i32
    %235 = arith.index_cast %c4_i32 : i32 to index
    %c0_70 = arith.constant 0 : index
    %c0_71 = arith.constant 0 : index
    %236 = vector.load %arg1[%235, %c0_70, %c0_71] : memref<8x8x256xf32, #tpu.memory_space<vmem>>, vector<1x8x256xf32>
    %237 = vector.shape_cast %236 : vector<1x8x256xf32> to vector<8x256xf32>
    %cst_72 = arith.constant dense<0.000000e+00> : vector<8x256xf32>
    %238 = tpu.matmul %199, %0, %cst_72 {dimension_numbers = #tpu.dot_dimension_numbers<[1], [0], [0], [1], [0, 0, 1, 1], [], []>} : vector<8x64xf32>, vector<64x256xf32>, vector<8x256xf32> -> vector<8x256xf32>
    %239 = arith.addf %237, %238 : vector<8x256xf32>
    %240 = vector.extract_strided_slice %239 {offsets = [0, 0], sizes = [8, 192], strides = [1, 1]} : vector<8x256xf32> to vector<8x192xf32>
    %241 = arith.negf %240 : vector<8x192xf32>
    %242 = math.exp %241 : vector<8x192xf32>
    %cst_73 = arith.constant 1.000000e+00 : f32
    %243 = vector.broadcast %cst_73 : f32 to vector<8x192xf32>
    %244 = arith.addf %243, %242 : vector<8x192xf32>
    %245 = arith.divf %243, %244 : vector<8x192xf32>
    %246 = vector.extract_strided_slice %239 {offsets = [0, 192], sizes = [8, 64], strides = [1, 1]} : vector<8x256xf32> to vector<8x64xf32>
    %247 = math.tanh %246 : vector<8x64xf32>
    %248 = vector.extract_strided_slice %245 {offsets = [0, 0], sizes = [8, 64], strides = [1, 1]} : vector<8x192xf32> to vector<8x64xf32>
    %249 = vector.extract_strided_slice %245 {offsets = [0, 64], sizes = [8, 64], strides = [1, 1]} : vector<8x192xf32> to vector<8x64xf32>
    %250 = vector.extract_strided_slice %245 {offsets = [0, 128], sizes = [8, 64], strides = [1, 1]} : vector<8x192xf32> to vector<8x64xf32>
    %251 = arith.mulf %249, %197 : vector<8x64xf32>
    %252 = arith.mulf %248, %247 : vector<8x64xf32>
    %253 = arith.addf %251, %252 : vector<8x64xf32>
    %254 = math.tanh %253 : vector<8x64xf32>
    %255 = arith.mulf %250, %254 : vector<8x64xf32>
    %c0_74 = arith.constant 0 : index
    %c0_75 = arith.constant 0 : index
    %256 = vector.load %arg7[%c0_74, %c0_75] : memref<8x128xf32, #tpu.memory_space<vmem>>, vector<8x64xf32>
    tpu.vector_store %arg7[%c0_74, %c0_75], %255 {strides = array<i32>} : memref<8x128xf32, #tpu.memory_space<vmem>>, vector<8x64xf32>,
    %c0_76 = arith.constant 0 : index
    %c64_77 = arith.constant 64 : index
    %257 = vector.load %arg7[%c0_76, %c64_77] : memref<8x128xf32, #tpu.memory_space<vmem>>, vector<8x4xf32>
    tpu.vector_store %arg7[%c0_76, %c64_77], %220 {strides = array<i32>} : memref<8x128xf32, #tpu.memory_space<vmem>>, vector<8x4xf32>,
    %c0_78 = arith.constant 0 : index
    %c0_79 = arith.constant 0 : index
    %258 = vector.load %arg7[%c0_78, %c0_79] : memref<8x128xf32, #tpu.memory_space<vmem>>, vector<8x128xf32>
    %cst_80 = arith.constant dense<0.000000e+00> : vector<8x16xf32>
    %259 = tpu.matmul %258, %1, %cst_80 {dimension_numbers = #tpu.dot_dimension_numbers<[1], [0], [0], [1], [0, 0, 1, 1], [], []>} : vector<8x128xf32>, vector<128x16xf32>, vector<8x16xf32> -> vector<8x16xf32>
    %260 = arith.addf %259, %4 : vector<8x16xf32>
    %261 = vector.extract_strided_slice %260 {offsets = [0, 0], sizes = [8, 12], strides = [1, 1]} : vector<8x16xf32> to vector<8x12xf32>
    %262 = arith.negf %261 : vector<8x12xf32>
    %263 = math.exp %262 : vector<8x12xf32>
    %cst_81 = arith.constant 1.000000e+00 : f32
    %264 = vector.broadcast %cst_81 : f32 to vector<8x12xf32>
    %265 = arith.addf %264, %263 : vector<8x12xf32>
    %266 = arith.divf %264, %265 : vector<8x12xf32>
    %267 = vector.extract_strided_slice %260 {offsets = [0, 12], sizes = [8, 4], strides = [1, 1]} : vector<8x16xf32> to vector<8x4xf32>
    %268 = math.tanh %267 : vector<8x4xf32>
    %269 = vector.extract_strided_slice %266 {offsets = [0, 0], sizes = [8, 4], strides = [1, 1]} : vector<8x12xf32> to vector<8x4xf32>
    %270 = vector.extract_strided_slice %266 {offsets = [0, 4], sizes = [8, 4], strides = [1, 1]} : vector<8x12xf32> to vector<8x4xf32>
    %271 = vector.extract_strided_slice %266 {offsets = [0, 8], sizes = [8, 4], strides = [1, 1]} : vector<8x12xf32> to vector<8x4xf32>
    %272 = arith.mulf %270, %218 : vector<8x4xf32>
    %273 = arith.mulf %269, %268 : vector<8x4xf32>
    %274 = arith.addf %272, %273 : vector<8x4xf32>
    %275 = math.tanh %274 : vector<8x4xf32>
    %276 = arith.mulf %271, %275 : vector<8x4xf32>
    %277 = arith.index_cast %c4_i32 : i32 to index
    %c0_82 = arith.constant 0 : index
    %c0_83 = arith.constant 0 : index
    %278 = vector.load %arg2[%277, %c0_82, %c0_83] : memref<8x8x4xf32, #tpu.memory_space<vmem>>, vector<1x8x4xf32>
    %279 = vector.shape_cast %278 : vector<1x8x4xf32> to vector<8x4xf32>
    %280 = arith.subf %276, %279 : vector<8x4xf32>
    %281 = arith.mulf %280, %280 : vector<8x4xf32>
    %cst_84 = arith.constant dense<0.000000e+00> : vector<8xf32>
    %282 = vector.multi_reduction <add>, %281, %cst_84 [1] : vector<8x4xf32> to vector<8xf32>
    %283 = vector.shape_cast %282 : vector<8xf32> to vector<8x1xf32>
    %284 = vector.broadcast %cst_10 : f32 to vector<8x1xf32>
    %285 = arith.mulf %283, %284 : vector<8x1xf32>
    %286 = vector.broadcast %c4_i32 : i32 to vector<8x8xi32>
    %287 = arith.cmpi eq, %5, %286 : vector<8x8xi32>
    %288 = vector.shape_cast %285 : vector<8x1xf32> to vector<8x1xf32>
    %289 = vector.broadcast %288 : vector<8x1xf32> to vector<8x8xf32>
    %290 = arith.select %287, %289, %234 : vector<8x8xi1>, vector<8x8xf32>
    %c5_i32 = arith.constant 5 : i32
    %291 = arith.index_cast %c5_i32 : i32 to index
    %c0_85 = arith.constant 0 : index
    %c0_86 = arith.constant 0 : index
    %292 = vector.load %arg1[%291, %c0_85, %c0_86] : memref<8x8x256xf32, #tpu.memory_space<vmem>>, vector<1x8x256xf32>
    %293 = vector.shape_cast %292 : vector<1x8x256xf32> to vector<8x256xf32>
    %cst_87 = arith.constant dense<0.000000e+00> : vector<8x256xf32>
    %294 = tpu.matmul %255, %0, %cst_87 {dimension_numbers = #tpu.dot_dimension_numbers<[1], [0], [0], [1], [0, 0, 1, 1], [], []>} : vector<8x64xf32>, vector<64x256xf32>, vector<8x256xf32> -> vector<8x256xf32>
    %295 = arith.addf %293, %294 : vector<8x256xf32>
    %296 = vector.extract_strided_slice %295 {offsets = [0, 0], sizes = [8, 192], strides = [1, 1]} : vector<8x256xf32> to vector<8x192xf32>
    %297 = arith.negf %296 : vector<8x192xf32>
    %298 = math.exp %297 : vector<8x192xf32>
    %cst_88 = arith.constant 1.000000e+00 : f32
    %299 = vector.broadcast %cst_88 : f32 to vector<8x192xf32>
    %300 = arith.addf %299, %298 : vector<8x192xf32>
    %301 = arith.divf %299, %300 : vector<8x192xf32>
    %302 = vector.extract_strided_slice %295 {offsets = [0, 192], sizes = [8, 64], strides = [1, 1]} : vector<8x256xf32> to vector<8x64xf32>
    %303 = math.tanh %302 : vector<8x64xf32>
    %304 = vector.extract_strided_slice %301 {offsets = [0, 0], sizes = [8, 64], strides = [1, 1]} : vector<8x192xf32> to vector<8x64xf32>
    %305 = vector.extract_strided_slice %301 {offsets = [0, 64], sizes = [8, 64], strides = [1, 1]} : vector<8x192xf32> to vector<8x64xf32>
    %306 = vector.extract_strided_slice %301 {offsets = [0, 128], sizes = [8, 64], strides = [1, 1]} : vector<8x192xf32> to vector<8x64xf32>
    %307 = arith.mulf %305, %253 : vector<8x64xf32>
    %308 = arith.mulf %304, %303 : vector<8x64xf32>
    %309 = arith.addf %307, %308 : vector<8x64xf32>
    %310 = math.tanh %309 : vector<8x64xf32>
    %311 = arith.mulf %306, %310 : vector<8x64xf32>
    %c0_89 = arith.constant 0 : index
    %c0_90 = arith.constant 0 : index
    %312 = vector.load %arg7[%c0_89, %c0_90] : memref<8x128xf32, #tpu.memory_space<vmem>>, vector<8x64xf32>
    tpu.vector_store %arg7[%c0_89, %c0_90], %311 {strides = array<i32>} : memref<8x128xf32, #tpu.memory_space<vmem>>, vector<8x64xf32>,
    %c0_91 = arith.constant 0 : index
    %c64_92 = arith.constant 64 : index
    %313 = vector.load %arg7[%c0_91, %c64_92] : memref<8x128xf32, #tpu.memory_space<vmem>>, vector<8x4xf32>
    tpu.vector_store %arg7[%c0_91, %c64_92], %276 {strides = array<i32>} : memref<8x128xf32, #tpu.memory_space<vmem>>, vector<8x4xf32>,
    %c0_93 = arith.constant 0 : index
    %c0_94 = arith.constant 0 : index
    %314 = vector.load %arg7[%c0_93, %c0_94] : memref<8x128xf32, #tpu.memory_space<vmem>>, vector<8x128xf32>
    %cst_95 = arith.constant dense<0.000000e+00> : vector<8x16xf32>
    %315 = tpu.matmul %314, %1, %cst_95 {dimension_numbers = #tpu.dot_dimension_numbers<[1], [0], [0], [1], [0, 0, 1, 1], [], []>} : vector<8x128xf32>, vector<128x16xf32>, vector<8x16xf32> -> vector<8x16xf32>
    %316 = arith.addf %315, %4 : vector<8x16xf32>
    %317 = vector.extract_strided_slice %316 {offsets = [0, 0], sizes = [8, 12], strides = [1, 1]} : vector<8x16xf32> to vector<8x12xf32>
    %318 = arith.negf %317 : vector<8x12xf32>
    %319 = math.exp %318 : vector<8x12xf32>
    %cst_96 = arith.constant 1.000000e+00 : f32
    %320 = vector.broadcast %cst_96 : f32 to vector<8x12xf32>
    %321 = arith.addf %320, %319 : vector<8x12xf32>
    %322 = arith.divf %320, %321 : vector<8x12xf32>
    %323 = vector.extract_strided_slice %316 {offsets = [0, 12], sizes = [8, 4], strides = [1, 1]} : vector<8x16xf32> to vector<8x4xf32>
    %324 = math.tanh %323 : vector<8x4xf32>
    %325 = vector.extract_strided_slice %322 {offsets = [0, 0], sizes = [8, 4], strides = [1, 1]} : vector<8x12xf32> to vector<8x4xf32>
    %326 = vector.extract_strided_slice %322 {offsets = [0, 4], sizes = [8, 4], strides = [1, 1]} : vector<8x12xf32> to vector<8x4xf32>
    %327 = vector.extract_strided_slice %322 {offsets = [0, 8], sizes = [8, 4], strides = [1, 1]} : vector<8x12xf32> to vector<8x4xf32>
    %328 = arith.mulf %326, %274 : vector<8x4xf32>
    %329 = arith.mulf %325, %324 : vector<8x4xf32>
    %330 = arith.addf %328, %329 : vector<8x4xf32>
    %331 = math.tanh %330 : vector<8x4xf32>
    %332 = arith.mulf %327, %331 : vector<8x4xf32>
    %333 = arith.index_cast %c5_i32 : i32 to index
    %c0_97 = arith.constant 0 : index
    %c0_98 = arith.constant 0 : index
    %334 = vector.load %arg2[%333, %c0_97, %c0_98] : memref<8x8x4xf32, #tpu.memory_space<vmem>>, vector<1x8x4xf32>
    %335 = vector.shape_cast %334 : vector<1x8x4xf32> to vector<8x4xf32>
    %336 = arith.subf %332, %335 : vector<8x4xf32>
    %337 = arith.mulf %336, %336 : vector<8x4xf32>
    %cst_99 = arith.constant dense<0.000000e+00> : vector<8xf32>
    %338 = vector.multi_reduction <add>, %337, %cst_99 [1] : vector<8x4xf32> to vector<8xf32>
    %339 = vector.shape_cast %338 : vector<8xf32> to vector<8x1xf32>
    %340 = vector.broadcast %cst_10 : f32 to vector<8x1xf32>
    %341 = arith.mulf %339, %340 : vector<8x1xf32>
    %342 = vector.broadcast %c5_i32 : i32 to vector<8x8xi32>
    %343 = arith.cmpi eq, %5, %342 : vector<8x8xi32>
    %344 = vector.shape_cast %341 : vector<8x1xf32> to vector<8x1xf32>
    %345 = vector.broadcast %344 : vector<8x1xf32> to vector<8x8xf32>
    %346 = arith.select %343, %345, %290 : vector<8x8xi1>, vector<8x8xf32>
    %c6_i32 = arith.constant 6 : i32
    %347 = arith.index_cast %c6_i32 : i32 to index
    %c0_100 = arith.constant 0 : index
    %c0_101 = arith.constant 0 : index
    %348 = vector.load %arg1[%347, %c0_100, %c0_101] : memref<8x8x256xf32, #tpu.memory_space<vmem>>, vector<1x8x256xf32>
    %349 = vector.shape_cast %348 : vector<1x8x256xf32> to vector<8x256xf32>
    %cst_102 = arith.constant dense<0.000000e+00> : vector<8x256xf32>
    %350 = tpu.matmul %311, %0, %cst_102 {dimension_numbers = #tpu.dot_dimension_numbers<[1], [0], [0], [1], [0, 0, 1, 1], [], []>} : vector<8x64xf32>, vector<64x256xf32>, vector<8x256xf32> -> vector<8x256xf32>
    %351 = arith.addf %349, %350 : vector<8x256xf32>
    %352 = vector.extract_strided_slice %351 {offsets = [0, 0], sizes = [8, 192], strides = [1, 1]} : vector<8x256xf32> to vector<8x192xf32>
    %353 = arith.negf %352 : vector<8x192xf32>
    %354 = math.exp %353 : vector<8x192xf32>
    %cst_103 = arith.constant 1.000000e+00 : f32
    %355 = vector.broadcast %cst_103 : f32 to vector<8x192xf32>
    %356 = arith.addf %355, %354 : vector<8x192xf32>
    %357 = arith.divf %355, %356 : vector<8x192xf32>
    %358 = vector.extract_strided_slice %351 {offsets = [0, 192], sizes = [8, 64], strides = [1, 1]} : vector<8x256xf32> to vector<8x64xf32>
    %359 = math.tanh %358 : vector<8x64xf32>
    %360 = vector.extract_strided_slice %357 {offsets = [0, 0], sizes = [8, 64], strides = [1, 1]} : vector<8x192xf32> to vector<8x64xf32>
    %361 = vector.extract_strided_slice %357 {offsets = [0, 64], sizes = [8, 64], strides = [1, 1]} : vector<8x192xf32> to vector<8x64xf32>
    %362 = vector.extract_strided_slice %357 {offsets = [0, 128], sizes = [8, 64], strides = [1, 1]} : vector<8x192xf32> to vector<8x64xf32>
    %363 = arith.mulf %361, %309 : vector<8x64xf32>
    %364 = arith.mulf %360, %359 : vector<8x64xf32>
    %365 = arith.addf %363, %364 : vector<8x64xf32>
    %366 = math.tanh %365 : vector<8x64xf32>
    %367 = arith.mulf %362, %366 : vector<8x64xf32>
    %c0_104 = arith.constant 0 : index
    %c0_105 = arith.constant 0 : index
    %368 = vector.load %arg7[%c0_104, %c0_105] : memref<8x128xf32, #tpu.memory_space<vmem>>, vector<8x64xf32>
    tpu.vector_store %arg7[%c0_104, %c0_105], %367 {strides = array<i32>} : memref<8x128xf32, #tpu.memory_space<vmem>>, vector<8x64xf32>,
    %c0_106 = arith.constant 0 : index
    %c64_107 = arith.constant 64 : index
    %369 = vector.load %arg7[%c0_106, %c64_107] : memref<8x128xf32, #tpu.memory_space<vmem>>, vector<8x4xf32>
    tpu.vector_store %arg7[%c0_106, %c64_107], %332 {strides = array<i32>} : memref<8x128xf32, #tpu.memory_space<vmem>>, vector<8x4xf32>,
    %c0_108 = arith.constant 0 : index
    %c0_109 = arith.constant 0 : index
    %370 = vector.load %arg7[%c0_108, %c0_109] : memref<8x128xf32, #tpu.memory_space<vmem>>, vector<8x128xf32>
    %cst_110 = arith.constant dense<0.000000e+00> : vector<8x16xf32>
    %371 = tpu.matmul %370, %1, %cst_110 {dimension_numbers = #tpu.dot_dimension_numbers<[1], [0], [0], [1], [0, 0, 1, 1], [], []>} : vector<8x128xf32>, vector<128x16xf32>, vector<8x16xf32> -> vector<8x16xf32>
    %372 = arith.addf %371, %4 : vector<8x16xf32>
    %373 = vector.extract_strided_slice %372 {offsets = [0, 0], sizes = [8, 12], strides = [1, 1]} : vector<8x16xf32> to vector<8x12xf32>
    %374 = arith.negf %373 : vector<8x12xf32>
    %375 = math.exp %374 : vector<8x12xf32>
    %cst_111 = arith.constant 1.000000e+00 : f32
    %376 = vector.broadcast %cst_111 : f32 to vector<8x12xf32>
    %377 = arith.addf %376, %375 : vector<8x12xf32>
    %378 = arith.divf %376, %377 : vector<8x12xf32>
    %379 = vector.extract_strided_slice %372 {offsets = [0, 12], sizes = [8, 4], strides = [1, 1]} : vector<8x16xf32> to vector<8x4xf32>
    %380 = math.tanh %379 : vector<8x4xf32>
    %381 = vector.extract_strided_slice %378 {offsets = [0, 0], sizes = [8, 4], strides = [1, 1]} : vector<8x12xf32> to vector<8x4xf32>
    %382 = vector.extract_strided_slice %378 {offsets = [0, 4], sizes = [8, 4], strides = [1, 1]} : vector<8x12xf32> to vector<8x4xf32>
    %383 = vector.extract_strided_slice %378 {offsets = [0, 8], sizes = [8, 4], strides = [1, 1]} : vector<8x12xf32> to vector<8x4xf32>
    %384 = arith.mulf %382, %330 : vector<8x4xf32>
    %385 = arith.mulf %381, %380 : vector<8x4xf32>
    %386 = arith.addf %384, %385 : vector<8x4xf32>
    %387 = math.tanh %386 : vector<8x4xf32>
    %388 = arith.mulf %383, %387 : vector<8x4xf32>
    %389 = arith.index_cast %c6_i32 : i32 to index
    %c0_112 = arith.constant 0 : index
    %c0_113 = arith.constant 0 : index
    %390 = vector.load %arg2[%389, %c0_112, %c0_113] : memref<8x8x4xf32, #tpu.memory_space<vmem>>, vector<1x8x4xf32>
    %391 = vector.shape_cast %390 : vector<1x8x4xf32> to vector<8x4xf32>
    %392 = arith.subf %388, %391 : vector<8x4xf32>
    %393 = arith.mulf %392, %392 : vector<8x4xf32>
    %cst_114 = arith.constant dense<0.000000e+00> : vector<8xf32>
    %394 = vector.multi_reduction <add>, %393, %cst_114 [1] : vector<8x4xf32> to vector<8xf32>
    %395 = vector.shape_cast %394 : vector<8xf32> to vector<8x1xf32>
    %396 = vector.broadcast %cst_10 : f32 to vector<8x1xf32>
    %397 = arith.mulf %395, %396 : vector<8x1xf32>
    %398 = vector.broadcast %c6_i32 : i32 to vector<8x8xi32>
    %399 = arith.cmpi eq, %5, %398 : vector<8x8xi32>
    %400 = vector.shape_cast %397 : vector<8x1xf32> to vector<8x1xf32>
    %401 = vector.broadcast %400 : vector<8x1xf32> to vector<8x8xf32>
    %402 = arith.select %399, %401, %346 : vector<8x8xi1>, vector<8x8xf32>
    %c7_i32 = arith.constant 7 : i32
    %403 = arith.index_cast %c7_i32 : i32 to index
    %c0_115 = arith.constant 0 : index
    %c0_116 = arith.constant 0 : index
    %404 = vector.load %arg1[%403, %c0_115, %c0_116] : memref<8x8x256xf32, #tpu.memory_space<vmem>>, vector<1x8x256xf32>
    %405 = vector.shape_cast %404 : vector<1x8x256xf32> to vector<8x256xf32>
    %cst_117 = arith.constant dense<0.000000e+00> : vector<8x256xf32>
    %406 = tpu.matmul %367, %0, %cst_117 {dimension_numbers = #tpu.dot_dimension_numbers<[1], [0], [0], [1], [0, 0, 1, 1], [], []>} : vector<8x64xf32>, vector<64x256xf32>, vector<8x256xf32> -> vector<8x256xf32>
    %407 = arith.addf %405, %406 : vector<8x256xf32>
    %408 = vector.extract_strided_slice %407 {offsets = [0, 0], sizes = [8, 192], strides = [1, 1]} : vector<8x256xf32> to vector<8x192xf32>
    %409 = arith.negf %408 : vector<8x192xf32>
    %410 = math.exp %409 : vector<8x192xf32>
    %cst_118 = arith.constant 1.000000e+00 : f32
    %411 = vector.broadcast %cst_118 : f32 to vector<8x192xf32>
    %412 = arith.addf %411, %410 : vector<8x192xf32>
    %413 = arith.divf %411, %412 : vector<8x192xf32>
    %414 = vector.extract_strided_slice %407 {offsets = [0, 192], sizes = [8, 64], strides = [1, 1]} : vector<8x256xf32> to vector<8x64xf32>
    %415 = math.tanh %414 : vector<8x64xf32>
    %416 = vector.extract_strided_slice %413 {offsets = [0, 0], sizes = [8, 64], strides = [1, 1]} : vector<8x192xf32> to vector<8x64xf32>
    %417 = vector.extract_strided_slice %413 {offsets = [0, 64], sizes = [8, 64], strides = [1, 1]} : vector<8x192xf32> to vector<8x64xf32>
    %418 = vector.extract_strided_slice %413 {offsets = [0, 128], sizes = [8, 64], strides = [1, 1]} : vector<8x192xf32> to vector<8x64xf32>
    %419 = arith.mulf %417, %365 : vector<8x64xf32>
    %420 = arith.mulf %416, %415 : vector<8x64xf32>
    %421 = arith.addf %419, %420 : vector<8x64xf32>
    %422 = math.tanh %421 : vector<8x64xf32>
    %423 = arith.mulf %418, %422 : vector<8x64xf32>
    %c0_119 = arith.constant 0 : index
    %c0_120 = arith.constant 0 : index
    %424 = vector.load %arg7[%c0_119, %c0_120] : memref<8x128xf32, #tpu.memory_space<vmem>>, vector<8x64xf32>
    tpu.vector_store %arg7[%c0_119, %c0_120], %423 {strides = array<i32>} : memref<8x128xf32, #tpu.memory_space<vmem>>, vector<8x64xf32>,
    %c0_121 = arith.constant 0 : index
    %c64_122 = arith.constant 64 : index
    %425 = vector.load %arg7[%c0_121, %c64_122] : memref<8x128xf32, #tpu.memory_space<vmem>>, vector<8x4xf32>
    tpu.vector_store %arg7[%c0_121, %c64_122], %388 {strides = array<i32>} : memref<8x128xf32, #tpu.memory_space<vmem>>, vector<8x4xf32>,
    %c0_123 = arith.constant 0 : index
    %c0_124 = arith.constant 0 : index
    %426 = vector.load %arg7[%c0_123, %c0_124] : memref<8x128xf32, #tpu.memory_space<vmem>>, vector<8x128xf32>
    %cst_125 = arith.constant dense<0.000000e+00> : vector<8x16xf32>
    %427 = tpu.matmul %426, %1, %cst_125 {dimension_numbers = #tpu.dot_dimension_numbers<[1], [0], [0], [1], [0, 0, 1, 1], [], []>} : vector<8x128xf32>, vector<128x16xf32>, vector<8x16xf32> -> vector<8x16xf32>
    %428 = arith.addf %427, %4 : vector<8x16xf32>
    %429 = vector.extract_strided_slice %428 {offsets = [0, 0], sizes = [8, 12], strides = [1, 1]} : vector<8x16xf32> to vector<8x12xf32>
    %430 = arith.negf %429 : vector<8x12xf32>
    %431 = math.exp %430 : vector<8x12xf32>
    %cst_126 = arith.constant 1.000000e+00 : f32
    %432 = vector.broadcast %cst_126 : f32 to vector<8x12xf32>
    %433 = arith.addf %432, %431 : vector<8x12xf32>
    %434 = arith.divf %432, %433 : vector<8x12xf32>
    %435 = vector.extract_strided_slice %428 {offsets = [0, 12], sizes = [8, 4], strides = [1, 1]} : vector<8x16xf32> to vector<8x4xf32>
    %436 = math.tanh %435 : vector<8x4xf32>
    %437 = vector.extract_strided_slice %434 {offsets = [0, 0], sizes = [8, 4], strides = [1, 1]} : vector<8x12xf32> to vector<8x4xf32>
    %438 = vector.extract_strided_slice %434 {offsets = [0, 4], sizes = [8, 4], strides = [1, 1]} : vector<8x12xf32> to vector<8x4xf32>
    %439 = vector.extract_strided_slice %434 {offsets = [0, 8], sizes = [8, 4], strides = [1, 1]} : vector<8x12xf32> to vector<8x4xf32>
    %440 = arith.mulf %438, %386 : vector<8x4xf32>
    %441 = arith.mulf %437, %436 : vector<8x4xf32>
    %442 = arith.addf %440, %441 : vector<8x4xf32>
    %443 = math.tanh %442 : vector<8x4xf32>
    %444 = arith.mulf %439, %443 : vector<8x4xf32>
    %445 = arith.index_cast %c7_i32 : i32 to index
    %c0_127 = arith.constant 0 : index
    %c0_128 = arith.constant 0 : index
    %446 = vector.load %arg2[%445, %c0_127, %c0_128] : memref<8x8x4xf32, #tpu.memory_space<vmem>>, vector<1x8x4xf32>
    %447 = vector.shape_cast %446 : vector<1x8x4xf32> to vector<8x4xf32>
    %448 = arith.subf %444, %447 : vector<8x4xf32>
    %449 = arith.mulf %448, %448 : vector<8x4xf32>
    %cst_129 = arith.constant dense<0.000000e+00> : vector<8xf32>
    %450 = vector.multi_reduction <add>, %449, %cst_129 [1] : vector<8x4xf32> to vector<8xf32>
    %451 = vector.shape_cast %450 : vector<8xf32> to vector<8x1xf32>
    %452 = vector.broadcast %cst_10 : f32 to vector<8x1xf32>
    %453 = arith.mulf %451, %452 : vector<8x1xf32>
    %454 = vector.broadcast %c7_i32 : i32 to vector<8x8xi32>
    %455 = arith.cmpi eq, %5, %454 : vector<8x8xi32>
    %456 = vector.shape_cast %453 : vector<8x1xf32> to vector<8x1xf32>
    %457 = vector.broadcast %456 : vector<8x1xf32> to vector<8x8xf32>
    %458 = arith.select %455, %457, %402 : vector<8x8xi1>, vector<8x8xf32>
    %c8_i32 = arith.constant 8 : i32
    %c0_130 = arith.constant 0 : index
    %c0_131 = arith.constant 0 : index
    %459 = vector.load %arg6[%c0_130, %c0_131] : memref<8x8xf32, #tpu.memory_space<vmem>>, vector<8x8xf32>
    tpu.vector_store %arg6[%c0_130, %c0_131], %458 {strides = array<i32>} : memref<8x8xf32, #tpu.memory_space<vmem>>, vector<8x8xf32>,
    return
  }
  func.func @transform_0(%arg0: i32) -> (i32, i32, i32) {
    %c0_i32 = arith.constant 0 : i32
    %c0_i32_0 = arith.constant 0 : i32
    %c0_i32_1 = arith.constant 0 : i32
    return %c0_i32, %arg0, %c0_i32_0 : i32, i32, i32
  }
  func.func @transform_1(%arg0: i32) -> (i32, i32, i32) {
    %c0_i32 = arith.constant 0 : i32
    %c0_i32_0 = arith.constant 0 : i32
    %c0_i32_1 = arith.constant 0 : i32
    return %c0_i32, %arg0, %c0_i32_0 : i32, i32, i32
  }
  func.func @transform_2(%arg0: i32) -> (i32, i32) {
    %c0_i32 = arith.constant 0 : i32
    %c0_i32_0 = arith.constant 0 : i32
    %c0_i32_1 = arith.constant 0 : i32
    return %c0_i32, %c0_i32_0 : i32, i32
  }
  func.func @transform_3(%arg0: i32) -> (i32, i32) {
    %c0_i32 = arith.constant 0 : i32
    %c0_i32_0 = arith.constant 0 : i32
    %c0_i32_1 = arith.constant 0 : i32
    return %c0_i32, %c0_i32_0 : i32, i32
  }
  func.func @transform_4(%arg0: i32) -> (i32, i32) {
    %c0_i32 = arith.constant 0 : i32
    %c0_i32_0 = arith.constant 0 : i32
    %c0_i32_1 = arith.constant 0 : i32
    return %c0_i32, %c0_i32_0 : i32, i32
  }
  func.func @transform_5(%arg0: i32) -> (i32, i32) {
    %c0_i32 = arith.constant 0 : i32
    %c0_i32_0 = arith.constant 0 : i32
    return %arg0, %c0_i32 : i32, i32
  }
}

</mosaic_0001>

<bundles_post_ra>
// kernel: tpu_custom_call.1
= control target key start
LH: loop header
LB: loop body
LE: loop exit
PB: predicated region body
PF: predicated region fallthrough
CT: control target
= control target key end

     0   :  { %10 = vsyncpa [#allocation4], 0  ;;  %s3577_s0 = inlined_call_operand.vmem [shape: f32[8,8,256], index: 0, kind: input, shape index: {}]   ;;  %s3578_s1 = inlined_call_operand.vmem [shape: f32[8,8,4], index: 1, kind: input, shape index: {}]   ;;  %s3579_s2 = inlined_call_operand.hbm [shape: f32[64,256], index: 2, kind: input, shape index: {}]   ;;  %s3580_s3 = inlined_call_operand.vmem [shape: f32[128,16], index: 3, kind: input, shape index: {}]   ;;  %s3581_s4 = inlined_call_operand.vmem [shape: f32[1,16], index: 4, kind: input, shape index: {}]   ;;  %s3582_s5 = inlined_call_operand.hbm [shape: f32[8,8], index: 5, kind: output, shape index: {}]  }
   0x1   :  { %11 = vsyncpa [#allocation5], 0  ;;  %s2633_s18 = smov [#allocation3]  }
   0x2   :  { %s21_s19 = sshll.u32 %s2633_s18, 4  ;;  %s22_s19 = int_to_ptr.vmem [resolvable:$true] %s21_s19 }
   0x3   :  { %s2597_s20 = scalar_lea.vmem %s22_s19, 2048  ;;  %p2602_p1 = scmp.lt.s32.totalorder %s22_s19, %s22_s19 }
   0x4   :  { %p2598_p0 = scmp.ne.s32.totalorder %s22_s19, %s2597_s20  ;;  %p2603_p2 = scmp.lt.s32.totalorder %s2597_s20, %s2597_s20 }
   0x6   :  { %p2604_p3 = por %p2603_p2, %p2602_p1 }
   0x8   :  { %p2605_p4 = pnand %p2604_p3, %p2598_p0 }
   0xa   :  { %2608 = shalt.err (!%p2605_p4)
}
   0xb   :  { %s2634_s21 = smov 256   ;;  %s2635_s22 = smov 16  }
   0xc   :  { %27 = dma.hbm_to_vmem [thread:$0]  %s3579_s2, 2048, %s22_s19, [#allocation4], %s2634_s21, %s2634_s21, %s2635_s22  }
   0xd   :  { %2629 = dma.done.wait [#allocation4], 2048  }
   0xe   :  { %2630 = vsyncadd [#allocation4], 4294965248  ;;  %v2636_v0 = vmov 0.0   ;;  %v2681_v1 = vld [vmem:[#allocation3 + $0x78] sm:$0xff]  ;;  %v2683_v2 = vld [vmem:[#allocation3 + $0x70] sm:$0xff]  ;;  %s2637_s26 = smov 64  }
   0xf   :  { %147 = vmatprep.mubr.f32.mxu1 %v2636_v0  ;;  %76 = vst [vmem:[#allocation2] sm:$0xff] %v2636_v0  ;;  %372 = vmatprep.mubr.f32.mxu0 %v2636_v0  ;;  %v2685_v3 = vld [vmem:[#allocation3 + $0x68] sm:$0xff]  ;;  %v2688_v4 = vld [vmem:[#allocation3 + $0x60] sm:$0xff]  ;;  %v2692_v5 = vld [vmem:[#allocation3 + $0x58] sm:$0xff]  ;;  %vm2638_vm0 = vmmov 0   ;;  %vm79_vm1 = vcmask 523264  }
  0x10   :  { %99 = vmatprep.subr.mxu1 %v2681_v1  ;;  %324 = vmatprep.subr.mxu0 %v2681_v1  ;;  %v2696_v6 = vld [vmem:[#allocation3 + $0x50] sm:$0xff]  ;;  %v2700_v7 = vld [vmem:[#allocation3 + $0x48] sm:$0xff]  ;;  %v2704_v8 = vld [vmem:[#allocation3 + $0x40] sm:$0xff]  ;;  %vm187_vm2 = vcmask 556544   ;;  %s2639_s15 = smov 116   ;;  %s2640_s18 = smov 4  }
  0x11   :  { %100 = vmatpush1.msra.mxu1 %v2683_v2  ;;  %325 = vmatpush1.msra.mxu0 %v2683_v2  ;;  %v2708_v9 = vld [vmem:[#allocation3 + $0x38] sm:$0xff]  ;;  %v2712_v10 = vld [vmem:[#allocation3 + $0x30] sm:$0xff]  ;;  %v2716_v11 = vld [vmem:[#allocation3 + $0x28] sm:$0xff]  ;;  %s2641_s19 = smov 56   ;;  %s2642_s7 = smov 8   ;;  %vm295_vm3 = vcmask 31744  }
  0x12   :  { %101 = vmatprep.subr.mxu1 %v2685_v3  ;;  %326 = vmatprep.subr.mxu0 %v2685_v3  ;;  %v2720_v12 = vld [vmem:[#allocation3 + $0x20] sm:$0xff]  ;;  %v2724_v13 = vld [vmem:[#allocation3 + $0x18] sm:$0xff]  ;;  %v2728_v14 = vld [vmem:[#allocation3 + $0x10] sm:$0xff]  ;;  %vm1898_vm12 = vcmask 64512  }
  0x13   :  { %102 = vmatpush1.msra.mxu1 %v2688_v4  ;;  %327 = vmatpush1.msra.mxu0 %v2688_v4  ;;  %v2732_v15 = vld [vmem:[#allocation3 + $0x8] sm:$0xff]  ;;  %v2736_v16 = vld [vmem:[#allocation3] sm:$0xff]  ;;  %v77_v22 = vld [vmem:[%s3577_s0] sm:$0xff] }
  0x14   :  { %103 = vmatprep.subr.mxu1 %v2692_v5  ;;  %328 = vmatprep.subr.mxu0 %v2692_v5  ;;  %v78_v18 = vld [vmem:[%s3577_s0 + $0x8] sm:$0xff]  ;;  %v2762_v30 = vld [vmem:[%s3580_s3 + $0x78] sm:$0xff]  ;;  %v2767_v31 = vld [vmem:[%s3580_s3 + $0x70] sm:$0xff] }
  0x15   :  { %104 = vmatpush1.msra.mxu1 %v2696_v6  ;;  %329 = vmatpush1.msra.mxu0 %v2696_v6  ;;  %v2774_v32 = vld [vmem:[%s3580_s3 + $0x68] sm:$0xff]  ;;  %v2781_v33 = vld [vmem:[%s3580_s3 + $0x60] sm:$0xff]  ;;  %v2788_v34 = vld [vmem:[%s3580_s3 + $0x58] sm:$0xff] }
  0x16   :  { %105 = vmatprep.subr.mxu1 %v2700_v7  ;;  %330 = vmatprep.subr.mxu0 %v2700_v7  ;;  %v2795_v35 = vld [vmem:[%s3580_s3 + $0x50] sm:$0xff]  ;;  %v2802_v36 = vld [vmem:[%s3580_s3 + $0x48] sm:$0xff]  ;;  %v2809_v37 = vld [vmem:[%s3580_s3 + $0x40] sm:$0xff] }
  0x17   :  { %106 = vmatpush1.msra.mxu1 %v2704_v8  ;;  %331 = vmatpush1.msra.mxu0 %v2704_v8  ;;  %v2816_v38 = vld [vmem:[%s3580_s3 + $0x38] sm:$0xff]  ;;  %v2823_v39 = vld [vmem:[%s3580_s3 + $0x30] sm:$0xff]  ;;  %v2835_v43 = vld [vmem:[%s3580_s3 + $0x28] sm:$0xff] }
  0x18   :  { %107 = vmatprep.subr.mxu1 %v2708_v9  ;;  %332 = vmatprep.subr.mxu0 %v2708_v9  ;;  %v2842_v44 = vld [vmem:[%s3580_s3 + $0x20] sm:$0xff]  ;;  %v2849_v45 = vld [vmem:[%s3580_s3 + $0x18] sm:$0xff]  ;;  %v2854_v46 = vld [vmem:[%s3580_s3 + $0x10] sm:$0xff] }
  0x19   :  { %108 = vmatpush1.msra.mxu1 %v2712_v10  ;;  %333 = vmatpush1.msra.mxu0 %v2712_v10  ;;  %v2863_v47 = vld [vmem:[%s3580_s3 + $0x8] sm:$0xff]  ;;  %v2870_v48 = vld [vmem:[%s3580_s3] sm:$0xff]  ;;  %v1920_v58 = vld [vmem:[%s3577_s0 + $0x18] sm:$0xff] }
  0x1a   :  { %109 = vmatprep.subr.mxu1 %v2716_v11  ;;  %334 = vmatprep.subr.mxu0 %v2716_v11  ;;  %v2939_v61 = vld [vmem:[%s3581_s4] ss:$0 sm:$0xff] }
  0x1b   :  { %110 = vmatpush1.msra.mxu1 %v2720_v12  ;;  %335 = vmatpush1.msra.mxu0 %v2720_v12 }
  0x1c   :  { %111 = vmatprep.subr.mxu1 %v2724_v13  ;;  %336 = vmatprep.subr.mxu0 %v2724_v13 }
  0x1d   :  { %112 = vmatpush1.msra.mxu1 %v2728_v14  ;;  %337 = vmatpush1.msra.mxu0 %v2728_v14 }
  0x1e   :  { %113 = vmatprep.subr.mxu1 %v2732_v15  ;;  %338 = vmatprep.subr.mxu0 %v2732_v15 }
  0x1f   :  { %114 = vmatpush1.msra.mxu1 %v2736_v16  ;;  %339 = vmatpush1.msra.mxu0 %v2736_v16 }
  0x20   :  { %148 = vmatmul.mubr.f32.vlgmr.msra.gmra.mxu1 %v2636_v0  ;;  %2104 = vmatprep.subr.mxu1 %v2636_v0 }
  0x21   :  { %2139 = vmatprep.subr.mxu0 %v2636_v0  ;;  %2105 = vmatpush3.msra.mxu1 %v2762_v30 }
  0x22   :  { %2106 = vmatprep.subr.mxu1 %v2636_v0  ;;  %2136 = vmatprep.mubr.msk.f32.mxu1 %vm2638_vm0, %v2636_v0 }
  0x23   :  { %2107 = vmatpush3.msra.mxu1 %v2767_v31 }
  0x24   :  { %2108 = vmatprep.subr.mxu1 %v2636_v0 }
  0x25   :  { %2109 = vmatpush3.msra.mxu1 %v2774_v32 }
  0x26   :  { %2110 = vmatprep.subr.mxu1 %v2636_v0 }
  0x27   :  { %2111 = vmatpush3.msra.mxu1 %v2781_v33 }
  0x28   :  { %2112 = vmatprep.subr.mxu1 %v2636_v0 }
  0x29   :  { %2113 = vmatpush3.msra.mxu1 %v2788_v34 }
  0x2a   :  { %2114 = vmatprep.subr.mxu1 %v2636_v0 }
  0x2b   :  { %2115 = vmatpush3.msra.mxu1 %v2795_v35 }
  0x2c   :  { %2116 = vmatprep.subr.mxu1 %v2636_v0 }
  0x2d   :  { %2117 = vmatpush3.msra.mxu1 %v2802_v36 }
  0x2e   :  { %2118 = vmatprep.subr.mxu1 %v2636_v0 }
  0x2f   :  { %2119 = vmatpush3.msra.mxu1 %v2809_v37 }
  0x30   :  { %2120 = vmatprep.subr.mxu1 %v2636_v0 }
  0x31   :  { %2121 = vmatpush3.msra.mxu1 %v2816_v38 }
  0x32   :  { %2122 = vmatprep.subr.mxu1 %v2636_v0 }
  0x33   :  { %2123 = vmatpush3.msra.mxu1 %v2823_v39 }
  0x34   :  { %2124 = vmatprep.subr.mxu1 %v2636_v0 }
  0x35   :  { %2125 = vmatpush3.msra.mxu1 %v2835_v43 }
  0x36   :  { %2126 = vmatprep.subr.mxu1 %v2636_v0 }
  0x37   :  { %2127 = vmatpush3.msra.mxu1 %v2842_v44 }
  0x38   :  { %2128 = vmatprep.subr.mxu1 %v2636_v0 }
  0x39   :  { %2129 = vmatpush3.msra.mxu1 %v2849_v45 }
  0x3a   :  { %2130 = vmatprep.subr.mxu1 %v2636_v0 }
  0x3b   :  { %2131 = vmatpush3.msra.mxu1 %v2854_v46 }
  0x3c   :  { %2132 = vmatprep.subr.mxu1 %v2636_v0 }
  0x3d   :  { %2133 = vmatpush3.msra.mxu1 %v2863_v47 }
  0x3e   :  { %2134 = vmatprep.subr.mxu1 %v2636_v0 }
  0x3f   :  { %2135 = vmatpush3.msra.mxu1 %v2870_v48 }
  0x40   :  { %552 = vmatprep.subr.mxu1 %v2681_v1 }
  0xe0   :  { %v149_v17 = vpop.f32.mrf.mxu1 }
  0xe1   :  { %v154_v23 = vadd.f32 %v149_v17, %v77_v22 }
  0xe2   :  { %v151_v19 = vpop.f32.mrf.mxu1 }
  0xe3   :  { %v2751_v20 = vadd.f32 %v151_v19, %v78_v18  ;;  %v1916_v24 = vmul.f32 -1.442695, %v154_v23 }
  0xe5   :  { %2396 = vtanh.f32 %v2751_v20  ;;  %v1917_v50 = vmul.f32 -1.442695, %v2751_v20  ;;  %v1919_v20 = vld [vmem:[%s3577_s0 + $0x10] sm:$0xff] }
  0xe6   :  { %2398 = vpow2.f32 %v1916_v24 }
  0xf2   :  { %v2397_v21 = vpop.eup %2396 }
  0xf3   :  { %171 = vrot.lane.b32.xlu0 %v2397_v21, %s2637_s26  ;;  %v2399_v25 = vpop.eup %2398 }
  0xf4   :  { %v162_v26 = vadd.f32 1.0, %v2399_v25 }
  0xf6   :  { %2400 = vrcp.f32 %v162_v26 }
 0x103   :  { %v2401_v27 = vpop.eup %2400 }
 0x104   :  { %v169_v40 = vmul.f32 0.0, %v2401_v27 }
 0x165   :  { %v172_v28 = vpop.permute.xlu0 %171 }
 0x166   :  { %v174_v29 = vmul.f32 %v2401_v27, %v172_v28 }
 0x168   :  { %176 = vrot.lane.b32.xlu0 %v174_v29, %s2637_s26 }
 0x1da   :  { %v177_v41 = vpop.permute.xlu0 %176 }
 0x1db   :  { %v2829_v42 = vadd.f32 %v177_v41, %v169_v40 }
 0x1dd   :  { %2402 = vtanh.f32 %v2829_v42 }
 0x1de   :  { %2404 = vpow2.f32 %v1917_v50 }
 0x1ea   :  { %v2403_v49 = vpop.eup %2402 }
 0x1eb   :  { %182 = vrot.lane.b32.xlu1 %v2403_v49, %s2637_s26  ;;  %v2405_v51 = vpop.eup %2404 }
 0x1ec   :  { %v163_v52 = vadd.f32 1.0, %v2405_v51 }
 0x1ee   :  { %2406 = vrcp.f32 %v163_v52 }
 0x1fb   :  { %v2407_v53 = vpop.eup %2406 }
 0x25d   :  { %v183_v54 = vpop.permute.xlu1 %182 }
 0x25e   :  { %v185_v55 = vmul.f32 %v2407_v53, %v183_v54 }
 0x260   :  { %186 = vst.msk [vmem:[#allocation2] sm:$0xff] %vm79_vm1, %v185_v55  ;;  %1921 = vmatmul.mubr.msk.f32.vlgmr.msra.gmra.mxu0 %vm79_vm1, %v185_v55 }
 0x261   :  { %188 = vst.msk [vmem:[#allocation2] sm:$0xff] %vm187_vm2, %v2636_v0  ;;  %2140 = vmatpush3.msra.mxu0 %v2762_v30  ;;  %2171 = vmatprep.mubr.msk.f32.mxu0 %vm2638_vm0, %v2636_v0 }
 0x262   :  { %2141 = vmatprep.subr.mxu0 %v2636_v0 }
 0x263   :  { %2142 = vmatpush3.msra.mxu0 %v2767_v31 }
 0x264   :  { %2143 = vmatprep.subr.mxu0 %v2636_v0 }
 0x265   :  { %2144 = vmatpush3.msra.mxu0 %v2774_v32 }
 0x266   :  { %2145 = vmatprep.subr.mxu0 %v2636_v0 }
 0x267   :  { %2146 = vmatpush3.msra.mxu0 %v2781_v33 }
 0x268   :  { %v189_v56 = vld [vmem:[#allocation2] sm:$0xff]  ;;  %2147 = vmatprep.subr.mxu0 %v2636_v0 }
 0x269   :  { %2137 = vmatmul.mubr.f32.vlgmr.msra.gmra.mxu1 %v189_v56  ;;  %2148 = vmatpush3.msra.mxu0 %v2788_v34 }
 0x26a   :  { %553 = vmatpush1.msra.mxu1 %v2683_v2  ;;  %600 = vmatprep.mubr.f32.mxu1 %v2636_v0 }
 0x26b   :  { %554 = vmatprep.subr.mxu1 %v2685_v3  ;;  %2149 = vmatprep.subr.mxu0 %v2636_v0 }
 0x26c   :  { %555 = vmatpush1.msra.mxu1 %v2688_v4  ;;  %2150 = vmatpush3.msra.mxu0 %v2795_v35 }
 0x26d   :  { %556 = vmatprep.subr.mxu1 %v2692_v5  ;;  %2151 = vmatprep.subr.mxu0 %v2636_v0 }
 0x26e   :  { %557 = vmatpush1.msra.mxu1 %v2696_v6  ;;  %2152 = vmatpush3.msra.mxu0 %v2802_v36 }
 0x26f   :  { %558 = vmatprep.subr.mxu1 %v2700_v7  ;;  %2153 = vmatprep.subr.mxu0 %v2636_v0 }
 0x270   :  { %559 = vmatpush1.msra.mxu1 %v2704_v8  ;;  %2154 = vmatpush3.msra.mxu0 %v2809_v37 }
 0x271   :  { %560 = vmatprep.subr.mxu1 %v2708_v9  ;;  %2155 = vmatprep.subr.mxu0 %v2636_v0 }
 0x272   :  { %561 = vmatpush1.msra.mxu1 %v2712_v10  ;;  %2156 = vmatpush3.msra.mxu0 %v2816_v38 }
 0x273   :  { %562 = vmatprep.subr.mxu1 %v2716_v11  ;;  %2157 = vmatprep.subr.mxu0 %v2636_v0 }
 0x274   :  { %563 = vmatpush1.msra.mxu1 %v2720_v12  ;;  %2158 = vmatpush3.msra.mxu0 %v2823_v39 }
 0x275   :  { %564 = vmatprep.subr.mxu1 %v2724_v13  ;;  %2159 = vmatprep.subr.mxu0 %v2636_v0 }
 0x276   :  { %565 = vmatpush1.msra.mxu1 %v2728_v14  ;;  %2160 = vmatpush3.msra.mxu0 %v2835_v43 }
 0x277   :  { %566 = vmatprep.subr.mxu1 %v2732_v15  ;;  %2161 = vmatprep.subr.mxu0 %v2636_v0 }
 0x278   :  { %567 = vmatpush1.msra.mxu1 %v2736_v16  ;;  %2162 = vmatpush3.msra.mxu0 %v2842_v44 }
 0x279   :  { %2163 = vmatprep.subr.mxu0 %v2636_v0  ;;  %2174 = vmatprep.subr.mxu1 %v2636_v0 }
 0x27a   :  { %2164 = vmatpush3.msra.mxu0 %v2849_v45 }
 0x27b   :  { %2165 = vmatprep.subr.mxu0 %v2636_v0 }
 0x27c   :  { %2166 = vmatpush3.msra.mxu0 %v2854_v46 }
 0x27d   :  { %2167 = vmatprep.subr.mxu0 %v2636_v0 }
 0x27e   :  { %2168 = vmatpush3.msra.mxu0 %v2863_v47 }
 0x27f   :  { %2169 = vmatprep.subr.mxu0 %v2636_v0 }
 0x280   :  { %2170 = vmatpush3.msra.mxu0 %v2870_v48 }
 0x281   :  { %780 = vmatprep.subr.mxu0 %v2681_v1 }
 0x320   :  { %v374_v57 = vpop.f32.mrf.mxu0 }
 0x321   :  { %v379_v21 = vadd.f32 %v1919_v20, %v374_v57 }
 0x322   :  { %v376_v59 = vpop.f32.mrf.mxu0 }
 0x323   :  { %v380_v60 = vadd.f32 %v1920_v58, %v376_v59  ;;  %v1922_v22 = vmul.f32 -1.442695, %v379_v21 }
 0x325   :  { %2408 = vtanh.f32 %v380_v60  ;;  %v1923_v59 = vmul.f32 -1.442695, %v380_v60 }
 0x329   :  { %v256_v62 = vpop.f32.mrf.mxu1 }
 0x32a   :  { %v257_v63 = vadd.f32 %v2939_v61, %v256_v62 }
 0x32b   :  { %v2138_v17 = vpop.f32.mrf.mxu1 }
 0x32c   :  { %2410 = vtanh.f32 %v257_v63  ;;  %v1918_v23 = vmul.f32 -1.442695, %v257_v63 }
 0x32d   :  { %2412 = vpow2.f32 %v1922_v22 }
 0x32e   :  { %2414 = vpow2.f32 %v1918_v23  ;;  %v1927_v23 = vld [vmem:[%s3577_s0 + $0x28] sm:$0xff] }
 0x332   :  { %v2409_v18 = vpop.eup %2408 }
 0x333   :  { %396 = vrot.lane.b32.xlu0 %v2409_v18, %s2637_s26 }
 0x339   :  { %v2411_v19 = vpop.eup %2410 }
 0x33a   :  { %269 = vrot.lane.b32.xlu1 %v2411_v19, %s2639_s15  ;;  %v2413_v24 = vpop.eup %2412 }
 0x33b   :  { %v387_v25 = vadd.f32 1.0, %v2413_v24  ;;  %v2415_v26 = vpop.eup %2414 }
 0x33c   :  { %v263_v27 = vadd.f32 1.0, %v2415_v26 }
 0x33d   :  { %2416 = vrcp.f32 %v387_v25 }
 0x33e   :  { %2418 = vrcp.f32 %v263_v27  ;;  %v1926_v27 = vld [vmem:[%s3577_s0 + $0x20] sm:$0xff] }
 0x34a   :  { %v2417_v28 = vpop.eup %2416 }
 0x34b   :  { %v2419_v41 = vpop.eup %2418  ;;  %v394_v51 = vmul.f32 %v2417_v28, %v2829_v42 }
 0x34c   :  { %v267_v54 = vmul.f32 0.0, %v2419_v41 }
 0x3a5   :  { %v397_v29 = vpop.permute.xlu0 %396 }
 0x3a6   :  { %v399_v40 = vmul.f32 %v2417_v28, %v397_v29 }
 0x3a8   :  { %401 = vrot.lane.b32.xlu0 %v399_v40, %s2637_s26 }
 0x3ac   :  { %v270_v49 = vpop.permute.xlu1 %269 }
 0x3ad   :  { %v272_v50 = vmul.f32 %v2419_v41, %v270_v49 }
 0x3af   :  { %274 = vrot.lane.b32.xlu1 %v272_v50, %s2640_s18 }
 0x41a   :  { %v402_v52 = vpop.permute.xlu0 %401 }
 0x41b   :  { %v2950_v53 = vadd.f32 %v402_v52, %v394_v51 }
 0x41d   :  { %2420 = vtanh.f32 %v2950_v53 }
 0x421   :  { %v275_v55 = vpop.permute.xlu1 %274 }
 0x422   :  { %v2953_v56 = vadd.f32 %v275_v55, %v267_v54 }
 0x424   :  { %2422 = vtanh.f32 %v2953_v56 }
 0x425   :  { %2424 = vpow2.f32 %v1923_v59 }
 0x42a   :  { %v2421_v57 = vpop.eup %2420 }
 0x42b   :  { %407 = vrot.lane.b32.xlu0 %v2421_v57, %s2637_s26 }
 0x431   :  { %v2423_v58 = vpop.eup %2422 }
 0x432   :  { %280 = vrot.lane.b32.xlu1 %v2423_v58, %s2640_s18  ;;  %v2425_v42 = vpop.eup %2424 }
 0x433   :  { %v388_v62 = vadd.f32 1.0, %v2425_v42 }
 0x435   :  { %2426 = vrcp.f32 %v388_v62 }
 0x442   :  { %v2427_v63 = vpop.eup %2426 }
 0x49d   :  { %v408_v17 = vpop.permute.xlu0 %407 }
 0x49e   :  { %v410_v18 = vmul.f32 %v2427_v63, %v408_v17 }
 0x4a0   :  { %411 = vst.msk [vmem:[#allocation2] sm:$0xff] %vm79_vm1, %v410_v18  ;;  %1928 = vmatmul.mubr.msk.f32.vlgmr.msra.gmra.mxu1 %vm79_vm1, %v410_v18 }
 0x4a1   :  { %2175 = vmatpush3.msra.mxu1 %v2762_v30  ;;  %2206 = vmatprep.mubr.msk.f32.mxu1 %vm2638_vm0, %v2636_v0 }
 0x4a2   :  { %2176 = vmatprep.subr.mxu1 %v2636_v0 }
 0x4a3   :  { %2177 = vmatpush3.msra.mxu1 %v2767_v31 }
 0x4a4   :  { %v281_v19 = vpop.permute.xlu1 %280  ;;  %2178 = vmatprep.subr.mxu1 %v2636_v0 }
 0x4a5   :  { %v2965_v60 = vmul.f32 %v2419_v41, %v281_v19  ;;  %2179 = vmatpush3.msra.mxu1 %v2774_v32 }
 0x4a6   :  { %2180 = vmatprep.subr.mxu1 %v2636_v0 }
 0x4a7   :  { %413 = vrot.lane.b32.xlu1 %v2965_v60, %s2641_s19  ;;  %2181 = vmatpush3.msra.mxu1 %v2781_v33 }
 0x4a8   :  { %2182 = vmatprep.subr.mxu1 %v2636_v0 }
 0x4a9   :  { %2183 = vmatpush3.msra.mxu1 %v2788_v34 }
 0x4aa   :  { %2184 = vmatprep.subr.mxu1 %v2636_v0 }
 0x4ab   :  { %2185 = vmatpush3.msra.mxu1 %v2795_v35 }
 0x4ac   :  { %2186 = vmatprep.subr.mxu1 %v2636_v0 }
 0x4ad   :  { %2187 = vmatpush3.msra.mxu1 %v2802_v36 }
 0x4ae   :  { %2188 = vmatprep.subr.mxu1 %v2636_v0 }
 0x4af   :  { %2189 = vmatpush3.msra.mxu1 %v2809_v37 }
 0x4b0   :  { %2190 = vmatprep.subr.mxu1 %v2636_v0 }
 0x4b1   :  { %2191 = vmatpush3.msra.mxu1 %v2816_v38 }
 0x4b2   :  { %2192 = vmatprep.subr.mxu1 %v2636_v0 }
 0x4b3   :  { %2193 = vmatpush3.msra.mxu1 %v2823_v39 }
 0x4b4   :  { %2194 = vmatprep.subr.mxu1 %v2636_v0 }
 0x4b5   :  { %2195 = vmatpush3.msra.mxu1 %v2835_v43 }
 0x4b6   :  { %2196 = vmatprep.subr.mxu1 %v2636_v0 }
 0x4b7   :  { %2197 = vmatpush3.msra.mxu1 %v2842_v44 }
 0x4b8   :  { %2198 = vmatprep.subr.mxu1 %v2636_v0 }
 0x4b9   :  { %2199 = vmatpush3.msra.mxu1 %v2849_v45 }
 0x4ba   :  { %2200 = vmatprep.subr.mxu1 %v2636_v0 }
 0x4bb   :  { %2201 = vmatpush3.msra.mxu1 %v2854_v46 }
 0x4bc   :  { %2202 = vmatprep.subr.mxu1 %v2636_v0 }
 0x4bd   :  { %2203 = vmatpush3.msra.mxu1 %v2863_v47 }
 0x4be   :  { %2204 = vmatprep.subr.mxu1 %v2636_v0 }
 0x4bf   :  { %2205 = vmatpush3.msra.mxu1 %v2870_v48 }
 0x4c0   :  { %1008 = vmatprep.subr.mxu1 %v2681_v1 }
 0x519   :  { %v414_v20 = vpop.permute.xlu1 %413 }
 0x51a   :  { %416 = vst.msk [vmem:[#allocation2] sm:$0xff] %vm187_vm2, %v414_v20 }
 0x521   :  { %v417_v21 = vld [vmem:[#allocation2] sm:$0xff] }
 0x522   :  { %2172 = vmatmul.mubr.f32.vlgmr.msra.gmra.mxu0 %v417_v21 }
 0x523   :  { %781 = vmatpush1.msra.mxu0 %v2683_v2  ;;  %828 = vmatprep.mubr.f32.mxu0 %v2636_v0 }
 0x524   :  { %782 = vmatprep.subr.mxu0 %v2685_v3 }
 0x525   :  { %783 = vmatpush1.msra.mxu0 %v2688_v4 }
 0x526   :  { %784 = vmatprep.subr.mxu0 %v2692_v5 }
 0x527   :  { %785 = vmatpush1.msra.mxu0 %v2696_v6 }
 0x528   :  { %786 = vmatprep.subr.mxu0 %v2700_v7 }
 0x529   :  { %787 = vmatpush1.msra.mxu0 %v2704_v8 }
 0x52a   :  { %788 = vmatprep.subr.mxu0 %v2708_v9 }
 0x52b   :  { %789 = vmatpush1.msra.mxu0 %v2712_v10 }
 0x52c   :  { %790 = vmatprep.subr.mxu0 %v2716_v11 }
 0x52d   :  { %791 = vmatpush1.msra.mxu0 %v2720_v12 }
 0x52e   :  { %792 = vmatprep.subr.mxu0 %v2724_v13 }
 0x52f   :  { %793 = vmatpush1.msra.mxu0 %v2728_v14 }
 0x530   :  { %794 = vmatprep.subr.mxu0 %v2732_v15 }
 0x531   :  { %795 = vmatpush1.msra.mxu0 %v2736_v16 }
 0x532   :  { %2209 = vmatprep.subr.mxu0 %v2636_v0 }
 0x560   :  { %v602_v22 = vpop.f32.mrf.mxu1 }
 0x561   :  { %v607_v28 = vadd.f32 %v1926_v27, %v602_v22 }
 0x562   :  { %v604_v24 = vpop.f32.mrf.mxu1 }
 0x563   :  { %v608_v25 = vadd.f32 %v1927_v23, %v604_v24  ;;  %v1929_v29 = vmul.f32 -1.442695, %v607_v28 }
 0x565   :  { %2428 = vtanh.f32 %v608_v25  ;;  %v1930_v22 = vmul.f32 -1.442695, %v608_v25 }
 0x566   :  { %2430 = vpow2.f32 %v1929_v29 }
 0x572   :  { %v2429_v26 = vpop.eup %2428 }
 0x573   :  { %624 = vrot.lane.b32.xlu1 %v2429_v26, %s2637_s26  ;;  %v2431_v40 = vpop.eup %2430 }
 0x574   :  { %v615_v41 = vadd.f32 1.0, %v2431_v40 }
 0x576   :  { %2432 = vrcp.f32 %v615_v41 }
 0x583   :  { %v2433_v52 = vpop.eup %2432 }
 0x584   :  { %v622_v62 = vmul.f32 %v2433_v52, %v2950_v53 }
 0x5e2   :  { %v484_v49 = vpop.f32.mrf.mxu0 }
 0x5e3   :  { %v485_v50 = vadd.f32 %v2939_v61, %v484_v49 }
 0x5e4   :  { %v2173_v51 = vpop.f32.mrf.mxu0 }
 0x5e5   :  { %2434 = vtanh.f32 %v485_v50  ;;  %v625_v54 = vpop.permute.xlu1 %624  ;;  %v1924_v58 = vmul.f32 -1.442695, %v485_v50  ;;  %v1934_v50 = vld [vmem:[%s3577_s0 + $0x38] sm:$0xff] }
 0x5e6   :  { %v627_v55 = vmul.f32 %v2433_v52, %v625_v54 }
 0x5e7   :  { %2436 = vpow2.f32 %v1924_v58 }
 0x5e8   :  { %629 = vrot.lane.b32.xlu1 %v627_v55, %s2637_s26 }
 0x5f2   :  { %v2435_v57 = vpop.eup %2434 }
 0x5f3   :  { %497 = vrot.lane.b32.xlu0 %v2435_v57, %s2639_s15 }
 0x5f4   :  { %v2437_v59 = vpop.eup %2436 }
 0x5f5   :  { %v491_v42 = vadd.f32 1.0, %v2437_v59 }
 0x5f7   :  { %2438 = vrcp.f32 %v491_v42 }
 0x604   :  { %v2439_v18 = vpop.eup %2438 }
 0x605   :  { %v495_v53 = vmul.f32 %v2439_v18, %v2953_v56 }
 0x65a   :  { %v630_v63 = vpop.permute.xlu1 %629 }
 0x65b   :  { %v3027_v17 = vadd.f32 %v630_v63, %v622_v62 }
 0x65d   :  { %2440 = vtanh.f32 %v3027_v17 }
 0x65e   :  { %2442 = vpow2.f32 %v1930_v22 }
 0x665   :  { %v498_v19 = vpop.permute.xlu0 %497 }
 0x666   :  { %v500_v20 = vmul.f32 %v2439_v18, %v498_v19 }
 0x668   :  { %502 = vrot.lane.b32.xlu0 %v500_v20, %s2640_s18 }
 0x66a   :  { %v2441_v21 = vpop.eup %2440 }
 0x66b   :  { %635 = vrot.lane.b32.xlu1 %v2441_v21, %s2637_s26  ;;  %v2443_v23 = vpop.eup %2442 }
 0x66c   :  { %v616_v24 = vadd.f32 1.0, %v2443_v23 }
 0x66e   :  { %2444 = vrcp.f32 %v616_v24 }
 0x67b   :  { %v2445_v28 = vpop.eup %2444 }
 0x6da   :  { %v503_v26 = vpop.permute.xlu0 %502 }
 0x6db   :  { %v3033_v27 = vadd.f32 %v503_v26, %v495_v53 }
 0x6dd   :  { %2446 = vtanh.f32 %v3033_v27  ;;  %v636_v29 = vpop.permute.xlu1 %635 }
 0x6de   :  { %v638_v40 = vmul.f32 %v2445_v28, %v636_v29 }
 0x6e0   :  { %639 = vst.msk [vmem:[#allocation2] sm:$0xff] %vm79_vm1, %v638_v40  ;;  %1935 = vmatmul.mubr.msk.f32.vlgmr.msra.gmra.mxu0 %vm79_vm1, %v638_v40 }
 0x6e1   :  { %2210 = vmatpush3.msra.mxu0 %v2762_v30  ;;  %2241 = vmatprep.mubr.msk.f32.mxu0 %vm2638_vm0, %v2636_v0 }
 0x6e2   :  { %2211 = vmatprep.subr.mxu0 %v2636_v0 }
 0x6e3   :  { %2212 = vmatpush3.msra.mxu0 %v2767_v31 }
 0x6e4   :  { %2213 = vmatprep.subr.mxu0 %v2636_v0 }
 0x6e5   :  { %2214 = vmatpush3.msra.mxu0 %v2774_v32 }
 0x6e6   :  { %2215 = vmatprep.subr.mxu0 %v2636_v0 }
 0x6e7   :  { %2216 = vmatpush3.msra.mxu0 %v2781_v33 }
 0x6e8   :  { %2217 = vmatprep.subr.mxu0 %v2636_v0 }
 0x6e9   :  { %2218 = vmatpush3.msra.mxu0 %v2788_v34 }
 0x6ea   :  { %v2447_v56 = vpop.eup %2446  ;;  %2219 = vmatprep.subr.mxu0 %v2636_v0 }
 0x6eb   :  { %508 = vrot.lane.b32.xlu0 %v2447_v56, %s2640_s18  ;;  %2220 = vmatpush3.msra.mxu0 %v2795_v35 }
 0x6ec   :  { %2221 = vmatprep.subr.mxu0 %v2636_v0 }
 0x6ed   :  { %2222 = vmatpush3.msra.mxu0 %v2802_v36 }
 0x6ee   :  { %2223 = vmatprep.subr.mxu0 %v2636_v0 }
 0x6ef   :  { %2224 = vmatpush3.msra.mxu0 %v2809_v37 }
 0x6f0   :  { %2225 = vmatprep.subr.mxu0 %v2636_v0 }
 0x6f1   :  { %2226 = vmatpush3.msra.mxu0 %v2816_v38 }
 0x6f2   :  { %2227 = vmatprep.subr.mxu0 %v2636_v0 }
 0x6f3   :  { %2228 = vmatpush3.msra.mxu0 %v2823_v39 }
 0x6f4   :  { %2229 = vmatprep.subr.mxu0 %v2636_v0 }
 0x6f5   :  { %2230 = vmatpush3.msra.mxu0 %v2835_v43 }
 0x6f6   :  { %2231 = vmatprep.subr.mxu0 %v2636_v0 }
 0x6f7   :  { %2232 = vmatpush3.msra.mxu0 %v2842_v44 }
 0x6f8   :  { %2233 = vmatprep.subr.mxu0 %v2636_v0 }
 0x6f9   :  { %2234 = vmatpush3.msra.mxu0 %v2849_v45 }
 0x6fa   :  { %2235 = vmatprep.subr.mxu0 %v2636_v0 }
 0x6fb   :  { %2236 = vmatpush3.msra.mxu0 %v2854_v46 }
 0x6fc   :  { %2237 = vmatprep.subr.mxu0 %v2636_v0 }
 0x6fd   :  { %2238 = vmatpush3.msra.mxu0 %v2863_v47 }
 0x6fe   :  { %2239 = vmatprep.subr.mxu0 %v2636_v0 }
 0x6ff   :  { %2240 = vmatpush3.msra.mxu0 %v2870_v48 }
 0x700   :  { %1236 = vmatprep.subr.mxu0 %v2681_v1 }
 0x75d   :  { %v509_v25 = vpop.permute.xlu0 %508 }
 0x75e   :  { %v3073_v41 = vmul.f32 %v2439_v18, %v509_v25 }
 0x760   :  { %641 = vrot.lane.b32.xlu0 %v3073_v41, %s2641_s19 }
 0x7a0   :  { %v830_v49 = vpop.f32.mrf.mxu0 }
 0x7a2   :  { %v832_v51 = vpop.f32.mrf.mxu0 }
 0x7a3   :  { %v836_v52 = vadd.f32 %v1934_v50, %v832_v51  ;;  %v1941_v50 = vld [vmem:[%s3577_s0 + $0x48] sm:$0xff] }
 0x7a5   :  { %2448 = vtanh.f32 %v836_v52  ;;  %v1937_v18 = vmul.f32 -1.442695, %v836_v52 }
 0x7b2   :  { %v2449_v54 = vpop.eup %2448 }
 0x7b3   :  { %852 = vrot.lane.b32.xlu0 %v2449_v54, %s2637_s26 }
 0x7d2   :  { %v642_v55 = vpop.permute.xlu0 %641 }
 0x7d3   :  { %644 = vst.msk [vmem:[#allocation2] sm:$0xff] %vm187_vm2, %v642_v55  ;;  %v1940_v55 = vld [vmem:[%s3577_s0 + $0x40] sm:$0xff] }
 0x7da   :  { %v645_v57 = vld [vmem:[#allocation2] sm:$0xff] }
 0x7db   :  { %2207 = vmatmul.mubr.f32.vlgmr.msra.gmra.mxu1 %v645_v57 }
 0x7dc   :  { %1009 = vmatpush1.msra.mxu1 %v2683_v2  ;;  %1056 = vmatprep.mubr.f32.mxu1 %v2636_v0  ;;  %v1933_v2 = vld [vmem:[%s3577_s0 + $0x30] sm:$0xff] }
 0x7dd   :  { %1010 = vmatprep.subr.mxu1 %v2685_v3  ;;  %v835_v3 = vadd.f32 %v1933_v2, %v830_v49 }
 0x7de   :  { %1011 = vmatpush1.msra.mxu1 %v2688_v4 }
 0x7df   :  { %1012 = vmatprep.subr.mxu1 %v2692_v5  ;;  %v1936_v4 = vmul.f32 -1.442695, %v835_v3 }
 0x7e0   :  { %1013 = vmatpush1.msra.mxu1 %v2696_v6 }
 0x7e1   :  { %1014 = vmatprep.subr.mxu1 %v2700_v7  ;;  %2450 = vpow2.f32 %v1936_v4 }
 0x7e2   :  { %1015 = vmatpush1.msra.mxu1 %v2704_v8 }
 0x7e3   :  { %1016 = vmatprep.subr.mxu1 %v2708_v9 }
 0x7e4   :  { %1017 = vmatpush1.msra.mxu1 %v2712_v10 }
 0x7e5   :  { %1018 = vmatprep.subr.mxu1 %v2716_v11 }
 0x7e6   :  { %1019 = vmatpush1.msra.mxu1 %v2720_v12 }
 0x7e7   :  { %1020 = vmatprep.subr.mxu1 %v2724_v13 }
 0x7e8   :  { %1021 = vmatpush1.msra.mxu1 %v2728_v14 }
 0x7e9   :  { %1022 = vmatprep.subr.mxu1 %v2732_v15 }
 0x7ea   :  { %1023 = vmatpush1.msra.mxu1 %v2736_v16 }
 0x7eb   :  { %2244 = vmatprep.subr.mxu1 %v2636_v0 }
 0x7ee   :  { %v2451_v5 = vpop.eup %2450 }
 0x7ef   :  { %v843_v6 = vadd.f32 1.0, %v2451_v5 }
 0x7f1   :  { %2452 = vrcp.f32 %v843_v6 }
 0x7fe   :  { %v2453_v7 = vpop.eup %2452 }
 0x7ff   :  { %v850_v11 = vmul.f32 %v2453_v7, %v3027_v17 }
 0x825   :  { %v853_v8 = vpop.permute.xlu0 %852 }
 0x826   :  { %v855_v9 = vmul.f32 %v2453_v7, %v853_v8 }
 0x828   :  { %857 = vrot.lane.b32.xlu0 %v855_v9, %s2637_s26 }
 0x89a   :  { %v858_v13 = vpop.permute.xlu0 %857 }
 0x89b   :  { %v712_v10 = vpop.f32.mrf.mxu1  ;;  %v3105_v59 = vadd.f32 %v858_v13, %v850_v11  ;;  %v3169_v11 = vld [vmem:[#allocation3 + $0x68] sm:$0xff]  ;;  %v3175_v13 = vld [vmem:[#allocation3 + $0x58] sm:$0xff] }
 0x89c   :  { %v713_v12 = vadd.f32 %v2939_v61, %v712_v10  ;;  %v3165_v10 = vld [vmem:[#allocation3 + $0x70] sm:$0xff] }
 0x89d   :  { %v2208_v58 = vpop.f32.mrf.mxu1 }
 0x89e   :  { %2454 = vtanh.f32 %v713_v12  ;;  %v1931_v63 = vmul.f32 -1.442695, %v713_v12  ;;  %v3172_v12 = vld [vmem:[#allocation3 + $0x60] sm:$0xff]  ;;  %v3178_v58 = vld [vmem:[#allocation3 + $0x50] sm:$0xff] }
 0x89f   :  { %2456 = vtanh.f32 %v3105_v59 }
 0x8a0   :  { %2458 = vpow2.f32 %v1931_v63  ;;  %v3187_v63 = vld [vmem:[#allocation3 + $0x38] sm:$0xff] }
 0x8a1   :  { %2460 = vpow2.f32 %v1937_v18  ;;  %v3190_v18 = vld [vmem:[#allocation3 + $0x30] sm:$0xff] }
 0x8ab   :  { %v2455_v42 = vpop.eup %2454 }
 0x8ac   :  { %725 = vrot.lane.b32.xlu1 %v2455_v42, %s2639_s15  ;;  %v2457_v62 = vpop.eup %2456  ;;  %v3181_v42 = vld [vmem:[#allocation3 + $0x48] sm:$0xff] }
 0x8ad   :  { %863 = vrot.lane.b32.xlu0 %v2457_v62, %s2637_s26  ;;  %v2459_v17 = vpop.eup %2458  ;;  %v3184_v62 = vld [vmem:[#allocation3 + $0x40] sm:$0xff] }
 0x8ae   :  { %v2461_v19 = vpop.eup %2460  ;;  %v719_v20 = vadd.f32 1.0, %v2459_v17  ;;  %v3193_v17 = vld [vmem:[#allocation3 + $0x28] sm:$0xff] }
 0x8af   :  { %v844_v21 = vadd.f32 1.0, %v2461_v19  ;;  %v3196_v19 = vld [vmem:[#allocation3 + $0x20] sm:$0xff] }
 0x8b0   :  { %2462 = vrcp.f32 %v719_v20  ;;  %v3199_v20 = vld [vmem:[#allocation3 + $0x18] sm:$0xff] }
 0x8b1   :  { %2464 = vrcp.f32 %v844_v21 }
 0x8bd   :  { %v2463_v22 = vpop.eup %2462 }
 0x8be   :  { %v2465_v53 = vpop.eup %2464  ;;  %v723_v29 = vmul.f32 %v2463_v22, %v3033_v27 }
 0x91e   :  { %v726_v23 = vpop.permute.xlu1 %725 }
 0x91f   :  { %v728_v24 = vmul.f32 %v2463_v22, %v726_v23  ;;  %v864_v26 = vpop.permute.xlu0 %863 }
 0x920   :  { %v866_v28 = vmul.f32 %v2465_v53, %v864_v26 }
 0x921   :  { %730 = vrot.lane.b32.xlu1 %v728_v24, %s2640_s18 }
 0x922   :  { %867 = vst.msk [vmem:[#allocation2] sm:$0xff] %vm79_vm1, %v866_v28  ;;  %1942 = vmatmul.mubr.msk.f32.vlgmr.msra.gmra.mxu1 %vm79_vm1, %v866_v28 }
 0x923   :  { %2245 = vmatpush3.msra.mxu1 %v2762_v30  ;;  %2276 = vmatprep.mubr.msk.f32.mxu1 %vm2638_vm0, %v2636_v0 }
 0x924   :  { %2246 = vmatprep.subr.mxu1 %v2636_v0 }
 0x925   :  { %2247 = vmatpush3.msra.mxu1 %v2767_v31 }
 0x926   :  { %2248 = vmatprep.subr.mxu1 %v2636_v0 }
 0x927   :  { %2249 = vmatpush3.msra.mxu1 %v2774_v32 }
 0x928   :  { %2250 = vmatprep.subr.mxu1 %v2636_v0 }
 0x929   :  { %2251 = vmatpush3.msra.mxu1 %v2781_v33 }
 0x92a   :  { %2252 = vmatprep.subr.mxu1 %v2636_v0 }
 0x92b   :  { %2253 = vmatpush3.msra.mxu1 %v2788_v34 }
 0x92c   :  { %2254 = vmatprep.subr.mxu1 %v2636_v0 }
 0x92d   :  { %2255 = vmatpush3.msra.mxu1 %v2795_v35 }
 0x92e   :  { %2256 = vmatprep.subr.mxu1 %v2636_v0 }
 0x92f   :  { %2257 = vmatpush3.msra.mxu1 %v2802_v36 }
 0x930   :  { %2258 = vmatprep.subr.mxu1 %v2636_v0 }
 0x931   :  { %2259 = vmatpush3.msra.mxu1 %v2809_v37 }
 0x932   :  { %2260 = vmatprep.subr.mxu1 %v2636_v0 }
 0x933   :  { %2261 = vmatpush3.msra.mxu1 %v2816_v38 }
 0x934   :  { %2262 = vmatprep.subr.mxu1 %v2636_v0 }
 0x935   :  { %2263 = vmatpush3.msra.mxu1 %v2823_v39 }
 0x936   :  { %2264 = vmatprep.subr.mxu1 %v2636_v0 }
 0x937   :  { %2265 = vmatpush3.msra.mxu1 %v2835_v43 }
 0x938   :  { %2266 = vmatprep.subr.mxu1 %v2636_v0 }
 0x939   :  { %2267 = vmatpush3.msra.mxu1 %v2842_v44 }
 0x93a   :  { %2268 = vmatprep.subr.mxu1 %v2636_v0 }
 0x93b   :  { %2269 = vmatpush3.msra.mxu1 %v2849_v45 }
 0x93c   :  { %2270 = vmatprep.subr.mxu1 %v2636_v0 }
 0x93d   :  { %2271 = vmatpush3.msra.mxu1 %v2854_v46 }
 0x93e   :  { %2272 = vmatprep.subr.mxu1 %v2636_v0 }
 0x93f   :  { %2273 = vmatpush3.msra.mxu1 %v2863_v47 }
 0x940   :  { %2274 = vmatprep.subr.mxu1 %v2636_v0 }
 0x941   :  { %2275 = vmatpush3.msra.mxu1 %v2870_v48 }
 0x942   :  { %1464 = vmatprep.subr.mxu1 %v2681_v1 }
 0x993   :  { %v731_v40 = vpop.permute.xlu1 %730 }
 0x994   :  { %v3148_v56 = vadd.f32 %v731_v40, %v723_v29 }
 0x996   :  { %2466 = vtanh.f32 %v3148_v56 }
 0x9a3   :  { %v2467_v25 = vpop.eup %2466 }
 0x9a4   :  { %736 = vrot.lane.b32.xlu1 %v2467_v25, %s2640_s18 }
 0x9e2   :  { %v1058_v49 = vpop.f32.mrf.mxu1 }
 0x9e3   :  { %v1063_v57 = vadd.f32 %v1940_v55, %v1058_v49 }
 0x9e4   :  { %v1060_v51 = vpop.f32.mrf.mxu1 }
 0x9e5   :  { %v1064_v52 = vadd.f32 %v1941_v50, %v1060_v51  ;;  %v1943_v2 = vmul.f32 -1.442695, %v1063_v57  ;;  %v1947_v50 = vld [vmem:[%s3577_s0 + $0x50] sm:$0xff] }
 0x9e7   :  { %2468 = vtanh.f32 %v1064_v52 }
 0x9e8   :  { %2470 = vpow2.f32 %v1943_v2 }
 0x9f4   :  { %v2469_v27 = vpop.eup %2468 }
 0x9f5   :  { %v2471_v3 = vpop.eup %2470 }
 0x9f6   :  { %v1071_v4 = vadd.f32 1.0, %v2471_v3 }
 0x9f8   :  { %2472 = vrcp.f32 %v1071_v4 }
 0xa05   :  { %v2473_v6 = vpop.eup %2472 }
 0xa06   :  { %v1078_v21 = vmul.f32 %v2473_v6, %v3105_v59 }
 0xa16   :  { %v737_v54 = vpop.permute.xlu1 %736 }
 0xa17   :  { %v3155_v1 = vmul.f32 %v2463_v22, %v737_v54 }
 0xa19   :  { %869 = vrot.lane.b32.xlu1 %v3155_v1, %s2641_s19 }
 0xa1d   :  { %1080 = vrot.lane.b32.xlu1 %v2469_v27, %s2637_s26 }
 0xa8b   :  { %v870_v5 = vpop.permute.xlu1 %869 }
 0xa8c   :  { %872 = vst.msk [vmem:[#allocation2] sm:$0xff] %vm187_vm2, %v870_v5  ;;  %v3280_v5 = vld [vmem:[#allocation3 + $0x10] sm:$0xff] }
 0xa8f   :  { %v1081_v7 = vpop.permute.xlu1 %1080 }
 0xa90   :  { %v1083_v8 = vmul.f32 %v2473_v6, %v1081_v7  ;;  %v3283_v6 = vld [vmem:[#allocation3 + $0x8] sm:$0xff]  ;;  %v3286_v7 = vld [vmem:[#allocation3] sm:$0xff] }
 0xa92   :  { %1085 = vrot.lane.b32.xlu1 %v1083_v8, %s2637_s26 }
 0xa93   :  { %v873_v9 = vld [vmem:[#allocation2] sm:$0xff] }
 0xa94   :  { %2242 = vmatmul.mubr.f32.vlgmr.msra.gmra.mxu0 %v873_v9 }
 0xa95   :  { %1237 = vmatpush1.msra.mxu0 %v3165_v10  ;;  %1284 = vmatprep.mubr.f32.mxu0 %v2636_v0 }
 0xa96   :  { %1238 = vmatprep.subr.mxu0 %v3169_v11 }
 0xa97   :  { %1239 = vmatpush1.msra.mxu0 %v3172_v12 }
 0xa98   :  { %1240 = vmatprep.subr.mxu0 %v3175_v13 }
 0xa99   :  { %1241 = vmatpush1.msra.mxu0 %v3178_v58 }
 0xa9a   :  { %1242 = vmatprep.subr.mxu0 %v3181_v42 }
 0xa9b   :  { %1243 = vmatpush1.msra.mxu0 %v3184_v62 }
 0xa9c   :  { %1244 = vmatprep.subr.mxu0 %v3187_v63 }
 0xa9d   :  { %1245 = vmatpush1.msra.mxu0 %v3190_v18 }
 0xa9e   :  { %1246 = vmatprep.subr.mxu0 %v3193_v17 }
 0xa9f   :  { %1247 = vmatpush1.msra.mxu0 %v3196_v19 }
 0xaa0   :  { %1248 = vmatprep.subr.mxu0 %v3199_v20 }
 0xaa1   :  { %1249 = vmatpush1.msra.mxu0 %v2728_v14 }
 0xaa2   :  { %1250 = vmatprep.subr.mxu0 %v2732_v15  ;;  %v1944_v15 = vmul.f32 -1.442695, %v1064_v52 }
 0xaa3   :  { %1251 = vmatpush1.msra.mxu0 %v2736_v16 }
 0xaa4   :  { %2279 = vmatprep.subr.mxu0 %v2636_v0 }
 0xb04   :  { %v1086_v22 = vpop.permute.xlu1 %1085 }
 0xb05   :  { %v3207_v23 = vadd.f32 %v1086_v22, %v1078_v21 }
 0xb07   :  { %2474 = vtanh.f32 %v3207_v23 }
 0xb14   :  { %v2475_v24 = vpop.eup %2474 }
 0xb15   :  { %1091 = vrot.lane.b32.xlu1 %v2475_v24, %s2637_s26 }
 0xb54   :  { %v940_v53 = vpop.f32.mrf.mxu0 }
 0xb55   :  { %v941_v26 = vadd.f32 %v2939_v61, %v940_v53 }
 0xb56   :  { %v2243_v14 = vpop.f32.mrf.mxu0 }
 0xb57   :  { %2476 = vtanh.f32 %v941_v26 }
 0xb58   :  { %2478 = vpow2.f32 %v1944_v15 }
 0xb64   :  { %v2477_v28 = vpop.eup %2476 }
 0xb65   :  { %953 = vrot.lane.b32.xlu0 %v2477_v28, %s2639_s15  ;;  %v2479_v16 = vpop.eup %2478 }
 0xb66   :  { %v1072_v59 = vadd.f32 1.0, %v2479_v16 }
 0xb68   :  { %2480 = vrcp.f32 %v1072_v59 }
 0xb75   :  { %v2481_v29 = vpop.eup %2480 }
 0xb87   :  { %v1092_v40 = vpop.permute.xlu1 %1091 }
 0xb88   :  { %v1094_v25 = vmul.f32 %v2481_v29, %v1092_v40  ;;  %v3311_v40 = vld [vmem:[%s3580_s3 + $0x70] sm:$0xff] }
 0xb8a   :  { %1095 = vst.msk [vmem:[#allocation2] sm:$0xff] %vm79_vm1, %v1094_v25  ;;  %1949 = vmatmul.mubr.msk.f32.vlgmr.msra.gmra.mxu0 %vm79_vm1, %v1094_v25  ;;  %v3318_v25 = vld [vmem:[%s3580_s3 + $0x68] sm:$0xff] }
 0xb8b   :  { %2280 = vmatpush3.msra.mxu0 %v2762_v30  ;;  %2311 = vmatprep.mubr.msk.f32.mxu0 %vm2638_vm0, %v2636_v0  ;;  %v2568_v30 = vld [vmem:[#allocation3 + $0x78] sm:$0xff] }
 0xb8c   :  { %2281 = vmatprep.subr.mxu0 %v2636_v0 }
 0xb8d   :  { %2282 = vmatpush3.msra.mxu0 %v2767_v31  ;;  %v1938_v31 = vmul.f32 -1.442695, %v941_v26 }
 0xb8e   :  { %2283 = vmatprep.subr.mxu0 %v2636_v0 }
 0xb8f   :  { %2284 = vmatpush3.msra.mxu0 %v2774_v32  ;;  %2482 = vpow2.f32 %v1938_v31  ;;  %v3332_v31 = vld [vmem:[%s3580_s3 + $0x58] sm:$0xff] }
 0xb90   :  { %2285 = vmatprep.subr.mxu0 %v2636_v0 }
 0xb91   :  { %2286 = vmatpush3.msra.mxu0 %v2781_v33 }
 0xb92   :  { %2287 = vmatprep.subr.mxu0 %v2636_v0 }
 0xb93   :  { %2288 = vmatpush3.msra.mxu0 %v2788_v34 }
 0xb94   :  { %2289 = vmatprep.subr.mxu0 %v2636_v0 }
 0xb95   :  { %2290 = vmatpush3.msra.mxu0 %v2795_v35 }
 0xb96   :  { %2291 = vmatprep.subr.mxu0 %v2636_v0 }
 0xb97   :  { %2292 = vmatpush3.msra.mxu0 %v2802_v36 }
 0xb98   :  { %2293 = vmatprep.subr.mxu0 %v2636_v0 }
 0xb99   :  { %2294 = vmatpush3.msra.mxu0 %v2809_v37 }
 0xb9a   :  { %2295 = vmatprep.subr.mxu0 %v2636_v0 }
 0xb9b   :  { %2296 = vmatpush3.msra.mxu0 %v2816_v38 }
 0xb9c   :  { %2297 = vmatprep.subr.mxu0 %v2636_v0  ;;  %v2483_v32 = vpop.eup %2482 }
 0xb9d   :  { %2298 = vmatpush3.msra.mxu0 %v2823_v39  ;;  %v947_v33 = vadd.f32 1.0, %v2483_v32  ;;  %v3339_v32 = vld [vmem:[%s3580_s3 + $0x50] sm:$0xff] }
 0xb9e   :  { %2299 = vmatprep.subr.mxu0 %v2636_v0 }
 0xb9f   :  { %2300 = vmatpush3.msra.mxu0 %v2835_v43  ;;  %2484 = vrcp.f32 %v947_v33  ;;  %v3346_v33 = vld [vmem:[%s3580_s3 + $0x48] sm:$0xff] }
 0xba0   :  { %2301 = vmatprep.subr.mxu0 %v2636_v0 }
 0xba1   :  { %2302 = vmatpush3.msra.mxu0 %v2842_v44 }
 0xba2   :  { %2303 = vmatprep.subr.mxu0 %v2636_v0 }
 0xba3   :  { %2304 = vmatpush3.msra.mxu0 %v2849_v45  ;;  %v1948_v45 = vld [vmem:[%s3577_s0 + $0x58] sm:$0xff] }
 0xba4   :  { %2305 = vmatprep.subr.mxu0 %v2636_v0 }
 0xba5   :  { %2306 = vmatpush3.msra.mxu0 %v2854_v46 }
 0xba6   :  { %2307 = vmatprep.subr.mxu0 %v2636_v0 }
 0xba7   :  { %2308 = vmatpush3.msra.mxu0 %v2863_v47 }
 0xba8   :  { %2309 = vmatprep.subr.mxu0 %v2636_v0 }
 0xba9   :  { %2310 = vmatpush3.msra.mxu0 %v2870_v48 }
 0xbaa   :  { %1692 = vmatprep.subr.mxu0 %v2568_v30  ;;  %v3325_v30 = vld [vmem:[%s3580_s3 + $0x60] sm:$0xff] }
 0xbac   :  { %v2485_v34 = vpop.eup %2484 }
 0xbad   :  { %v951_v37 = vmul.f32 %v2485_v34, %v3148_v56 }
 0xbd7   :  { %v954_v35 = vpop.permute.xlu0 %953 }
 0xbd8   :  { %v956_v36 = vmul.f32 %v2485_v34, %v954_v35  ;;  %v3360_v35 = vld [vmem:[%s3580_s3 + $0x38] sm:$0xff] }
 0xbda   :  { %958 = vrot.lane.b32.xlu0 %v956_v36, %s2640_s18  ;;  %v3367_v36 = vld [vmem:[%s3580_s3 + $0x30] sm:$0xff] }
 0xc4a   :  { %v1286_v44 = vpop.f32.mrf.mxu0 }
 0xc4b   :  { %v1291_v51 = vadd.f32 %v1947_v50, %v1286_v44  ;;  %v3395_v44 = vld [vmem:[%s3580_s3 + $0x10] sm:$0xff] }
 0xc4c   :  { %v959_v38 = vpop.permute.xlu0 %958  ;;  %v1288_v46 = vpop.f32.mrf.mxu0 }
 0xc4d   :  { %v3250_v39 = vadd.f32 %v959_v38, %v951_v37  ;;  %v1292_v47 = vadd.f32 %v1948_v45, %v1288_v46  ;;  %v1950_v52 = vmul.f32 -1.442695, %v1291_v51  ;;  %v3374_v37 = vld [vmem:[%s3580_s3 + $0x28] sm:$0xff]  ;;  %v3381_v38 = vld [vmem:[%s3580_s3 + $0x20] sm:$0xff] }
 0xc4e   :  { %v3402_v45 = vld [vmem:[%s3580_s3 + $0x8] sm:$0xff]  ;;  %v3409_v46 = vld [vmem:[%s3580_s3] sm:$0xff] }
 0xc4f   :  { %2486 = vtanh.f32 %v3250_v39  ;;  %v1951_v14 = vmul.f32 -1.442695, %v1292_v47 }
 0xc50   :  { %2488 = vtanh.f32 %v1292_v47 }
 0xc51   :  { %2490 = vpow2.f32 %v1950_v52 }
 0xc5c   :  { %v2487_v43 = vpop.eup %2486 }
 0xc5d   :  { %964 = vrot.lane.b32.xlu0 %v2487_v43, %s2640_s18  ;;  %v2489_v56 = vpop.eup %2488  ;;  %v3388_v43 = vld [vmem:[%s3580_s3 + $0x18] sm:$0xff] }
 0xc5e   :  { %v2491_v54 = vpop.eup %2490 }
 0xc5f   :  { %v1299_v27 = vadd.f32 1.0, %v2491_v54 }
 0xc61   :  { %2492 = vrcp.f32 %v1299_v27 }
 0xc6e   :  { %v2493_v57 = vpop.eup %2492 }
 0xc6f   :  { %v1306_v8 = vmul.f32 %v2493_v57, %v3207_v23 }
 0xccf   :  { %v965_v48 = vpop.permute.xlu0 %964 }
 0xcd0   :  { %v3257_v49 = vmul.f32 %v2485_v34, %v965_v48  ;;  %v3353_v34 = vld [vmem:[%s3580_s3 + $0x40] sm:$0xff] }
 0xcd2   :  { %1097 = vrot.lane.b32.xlu0 %v3257_v49, %s2641_s19 }
 0xcd6   :  { %1308 = vrot.lane.b32.xlu0 %v2489_v56, %s2637_s26 }
 0xd44   :  { %v1098_v55 = vpop.permute.xlu0 %1097 }
 0xd45   :  { %1100 = vst.msk [vmem:[#allocation2] sm:$0xff] %vm187_vm2, %v1098_v55 }
 0xd48   :  { %v1309_v2 = vpop.permute.xlu0 %1308 }
 0xd49   :  { %v1311_v3 = vmul.f32 %v2493_v57, %v1309_v2 }
 0xd4b   :  { %1313 = vrot.lane.b32.xlu0 %v1311_v3, %s2637_s26  ;;  %v1955_v3 = vld [vmem:[%s3577_s0 + $0x68] sm:$0xff] }
 0xd4c   :  { %v1101_v4 = vld [vmem:[#allocation2] sm:$0xff] }
 0xd4d   :  { %2277 = vmatmul.mubr.f32.vlgmr.msra.gmra.mxu1 %v1101_v4 }
 0xd4e   :  { %1465 = vmatpush1.msra.mxu1 %v3165_v10  ;;  %1512 = vmatprep.mubr.f32.mxu1 %v2636_v0 }
 0xd4f   :  { %1466 = vmatprep.subr.mxu1 %v3169_v11 }
 0xd50   :  { %1467 = vmatpush1.msra.mxu1 %v3172_v12 }
 0xd51   :  { %1468 = vmatprep.subr.mxu1 %v3175_v13 }
 0xd52   :  { %1469 = vmatpush1.msra.mxu1 %v3178_v58 }
 0xd53   :  { %1470 = vmatprep.subr.mxu1 %v3181_v42 }
 0xd54   :  { %1471 = vmatpush1.msra.mxu1 %v3184_v62 }
 0xd55   :  { %1472 = vmatprep.subr.mxu1 %v3187_v63 }
 0xd56   :  { %1473 = vmatpush1.msra.mxu1 %v3190_v18 }
 0xd57   :  { %1474 = vmatprep.subr.mxu1 %v3193_v17 }
 0xd58   :  { %1475 = vmatpush1.msra.mxu1 %v3196_v19 }
 0xd59   :  { %1476 = vmatprep.subr.mxu1 %v3199_v20 }
 0xd5a   :  { %1477 = vmatpush1.msra.mxu1 %v3280_v5 }
 0xd5b   :  { %1478 = vmatprep.subr.mxu1 %v3283_v6 }
 0xd5c   :  { %1479 = vmatpush1.msra.mxu1 %v3286_v7 }
 0xd5d   :  { %2314 = vmatprep.subr.mxu1 %v2636_v0 }
 0xdbd   :  { %v1314_v9 = vpop.permute.xlu0 %1313 }
 0xdbe   :  { %v3291_v21 = vadd.f32 %v1314_v9, %v1306_v8 }
 0xdc0   :  { %2494 = vtanh.f32 %v3291_v21 }
 0xdcd   :  { %v2495_v22 = vpop.eup %2494 }
 0xdce   :  { %1319 = vrot.lane.b32.xlu0 %v2495_v22, %s2637_s26 }
 0xe0d   :  { %v1168_v24 = vpop.f32.mrf.mxu1 }
 0xe0e   :  { %v1169_v53 = vadd.f32 %v2939_v61, %v1168_v24  ;;  %v3302_v61 = vld [vmem:[%s3580_s3 + $0x78] sm:$0xff]  ;;  %v1954_v24 = vld [vmem:[%s3577_s0 + $0x60] sm:$0xff] }
 0xe0f   :  { %v2278_v26 = vpop.f32.mrf.mxu1 }
 0xe10   :  { %2496 = vtanh.f32 %v1169_v53  ;;  %v1945_v47 = vmul.f32 -1.442695, %v1169_v53 }
 0xe11   :  { %2498 = vpow2.f32 %v1951_v14 }
 0xe1d   :  { %v2497_v15 = vpop.eup %2496 }
 0xe1e   :  { %1181 = vrot.lane.b32.xlu1 %v2497_v15, %s2639_s15  ;;  %v2499_v28 = vpop.eup %2498 }
 0xe1f   :  { %v1300_v23 = vadd.f32 1.0, %v2499_v28 }
 0xe21   :  { %2500 = vrcp.f32 %v1300_v23 }
 0xe22   :  { %2502 = vpow2.f32 %v1945_v47 }
 0xe2e   :  { %v2501_v16 = vpop.eup %2500 }
 0xe2f   :  { %v2503_v48 = vpop.eup %2502 }
 0xe30   :  { %v1175_v56 = vadd.f32 1.0, %v2503_v48 }
 0xe32   :  { %2504 = vrcp.f32 %v1175_v56 }
 0xe3f   :  { %v2505_v50 = vpop.eup %2504 }
 0xe40   :  { %v1320_v59 = vpop.permute.xlu0 %1319  ;;  %v1179_v54 = vmul.f32 %v2505_v50, %v3250_v39 }
 0xe41   :  { %v1322_v29 = vmul.f32 %v2501_v16, %v1320_v59 }
 0xe43   :  { %1323 = vst.msk [vmem:[#allocation2] sm:$0xff] %vm79_vm1, %v1322_v29  ;;  %1956 = vmatmul.mubr.msk.f32.vlgmr.msra.gmra.mxu1 %vm79_vm1, %v1322_v29 }
 0xe44   :  { %2315 = vmatpush3.msra.mxu1 %v3302_v61  ;;  %2346 = vmatprep.mubr.msk.f32.mxu1 %vm2638_vm0, %v2636_v0 }
 0xe45   :  { %2316 = vmatprep.subr.mxu1 %v2636_v0 }
 0xe46   :  { %2317 = vmatpush3.msra.mxu1 %v3311_v40 }
 0xe47   :  { %2318 = vmatprep.subr.mxu1 %v2636_v0 }
 0xe48   :  { %2319 = vmatpush3.msra.mxu1 %v3318_v25 }
 0xe49   :  { %2320 = vmatprep.subr.mxu1 %v2636_v0 }
 0xe4a   :  { %2321 = vmatpush3.msra.mxu1 %v3325_v30 }
 0xe4b   :  { %2322 = vmatprep.subr.mxu1 %v2636_v0 }
 0xe4c   :  { %2323 = vmatpush3.msra.mxu1 %v3332_v31 }
 0xe4d   :  { %2324 = vmatprep.subr.mxu1 %v2636_v0 }
 0xe4e   :  { %2325 = vmatpush3.msra.mxu1 %v3339_v32 }
 0xe4f   :  { %2326 = vmatprep.subr.mxu1 %v2636_v0 }
 0xe50   :  { %2327 = vmatpush3.msra.mxu1 %v3346_v33 }
 0xe51   :  { %2328 = vmatprep.subr.mxu1 %v2636_v0 }
 0xe52   :  { %2329 = vmatpush3.msra.mxu1 %v3353_v34 }
 0xe53   :  { %2330 = vmatprep.subr.mxu1 %v2636_v0 }
 0xe54   :  { %2331 = vmatpush3.msra.mxu1 %v3360_v35 }
 0xe55   :  { %2332 = vmatprep.subr.mxu1 %v2636_v0 }
 0xe56   :  { %2333 = vmatpush3.msra.mxu1 %v3367_v36 }
 0xe57   :  { %2334 = vmatprep.subr.mxu1 %v2636_v0 }
 0xe58   :  { %2335 = vmatpush3.msra.mxu1 %v3374_v37 }
 0xe59   :  { %2336 = vmatprep.subr.mxu1 %v2636_v0 }
 0xe5a   :  { %2337 = vmatpush3.msra.mxu1 %v3381_v38 }
 0xe5b   :  { %2338 = vmatprep.subr.mxu1 %v2636_v0 }
 0xe5c   :  { %2339 = vmatpush3.msra.mxu1 %v3388_v43 }
 0xe5d   :  { %2340 = vmatprep.subr.mxu1 %v2636_v0 }
 0xe5e   :  { %2341 = vmatpush3.msra.mxu1 %v3395_v44 }
 0xe5f   :  { %2342 = vmatprep.subr.mxu1 %v2636_v0 }
 0xe60   :  { %2343 = vmatpush3.msra.mxu1 %v3402_v45 }
 0xe61   :  { %2344 = vmatprep.subr.mxu1 %v2636_v0 }
 0xe62   :  { %2345 = vmatpush3.msra.mxu1 %v3409_v46 }
 0xe90   :  { %v1182_v51 = vpop.permute.xlu1 %1181 }
 0xe91   :  { %v1184_v52 = vmul.f32 %v2505_v50, %v1182_v51 }
 0xe93   :  { %1186 = vrot.lane.b32.xlu1 %v1184_v52, %s2640_s18 }
 0xf03   :  { %v1514_v2 = vpop.f32.mrf.mxu1 }
 0xf04   :  { %v1519_v53 = vadd.f32 %v1954_v24, %v1514_v2 }
 0xf05   :  { %v1187_v27 = vpop.permute.xlu1 %1186  ;;  %v1516_v4 = vpop.f32.mrf.mxu1 }
 0xf06   :  { %v3414_v55 = vadd.f32 %v1187_v27, %v1179_v54  ;;  %v1520_v8 = vadd.f32 %v1955_v3, %v1516_v4  ;;  %v1957_v26 = vmul.f32 -1.442695, %v1519_v53 }
 0xf08   :  { %2506 = vtanh.f32 %v3414_v55 }
 0xf09   :  { %2508 = vtanh.f32 %v1520_v8 }
 0xf0a   :  { %2510 = vpow2.f32 %v1957_v26 }
 0xf15   :  { %v2507_v57 = vpop.eup %2506 }
 0xf16   :  { %1192 = vrot.lane.b32.xlu1 %v2507_v57, %s2640_s18  ;;  %v2509_v39 = vpop.eup %2508 }
 0xf17   :  { %v2511_v14 = vpop.eup %2510 }
 0xf18   :  { %v1527_v15 = vadd.f32 1.0, %v2511_v14 }
 0xf1a   :  { %2512 = vrcp.f32 %v1527_v15 }
 0xf27   :  { %v2513_v23 = vpop.eup %2512 }
 0xf88   :  { %v1193_v9 = vpop.permute.xlu1 %1192 }
 0xf89   :  { %v3421_v22 = vmul.f32 %v2505_v50, %v1193_v9 }
 0xf8b   :  { %1325 = vrot.lane.b32.xlu1 %v3421_v22, %s2641_s19 }
 0xf8f   :  { %1536 = vrot.lane.b32.xlu1 %v2509_v39, %s2637_s26 }
 0xffd   :  { %v1326_v28 = vpop.permute.xlu1 %1325 }
 0xffe   :  { %1328 = vst.msk [vmem:[#allocation2] sm:$0xff] %vm187_vm2, %v1326_v28 }
0x1001   :  { %v1537_v16 = vpop.permute.xlu1 %1536 }
0x1002   :  { %v1539_v59 = vmul.f32 %v2513_v23, %v1537_v16 }
0x1004   :  { %1541 = vrot.lane.b32.xlu1 %v1539_v59, %s2637_s26 }
0x1005   :  { %v1329_v29 = vld [vmem:[#allocation2] sm:$0xff] }
0x1006   :  { %2312 = vmatmul.mubr.f32.vlgmr.msra.gmra.mxu0 %v1329_v29 }
0x1007   :  { %1693 = vmatpush1.msra.mxu0 %v3165_v10  ;;  %1740 = vmatprep.mubr.f32.mxu0 %v2636_v0  ;;  %v1534_v10 = vmul.f32 %v2513_v23, %v3291_v21 }
0x1008   :  { %1694 = vmatprep.subr.mxu0 %v3169_v11 }
0x1009   :  { %1695 = vmatpush1.msra.mxu0 %v3172_v12 }
0x100a   :  { %1696 = vmatprep.subr.mxu0 %v3175_v13 }
0x100b   :  { %1697 = vmatpush1.msra.mxu0 %v3178_v58 }
0x100c   :  { %1698 = vmatprep.subr.mxu0 %v3181_v42  ;;  %v3456_v42 = vld [vmem:[%s3581_s4] ss:$0 sm:$0xff] }
0x100d   :  { %1699 = vmatpush1.msra.mxu0 %v3184_v62 }
0x100e   :  { %1700 = vmatprep.subr.mxu0 %v3187_v63 }
0x100f   :  { %1701 = vmatpush1.msra.mxu0 %v3190_v18  ;;  %v1958_v18 = vmul.f32 -1.442695, %v1520_v8 }
0x1010   :  { %1702 = vmatprep.subr.mxu0 %v3193_v17 }
0x1011   :  { %1703 = vmatpush1.msra.mxu0 %v3196_v19 }
0x1012   :  { %1704 = vmatprep.subr.mxu0 %v3199_v20 }
0x1013   :  { %1705 = vmatpush1.msra.mxu0 %v3280_v5 }
0x1014   :  { %1706 = vmatprep.subr.mxu0 %v3283_v6 }
0x1015   :  { %1707 = vmatpush1.msra.mxu0 %v3286_v7 }
0x1016   :  { %2349 = vmatprep.subr.mxu0 %v2636_v0 }
0x1076   :  { %v1542_v11 = vpop.permute.xlu1 %1541 }
0x1077   :  { %v3449_v12 = vadd.f32 %v1542_v11, %v1534_v10 }
0x1079   :  { %2514 = vtanh.f32 %v3449_v12 }
0x1086   :  { %v2515_v13 = vpop.eup %2514 }
0x1087   :  { %1547 = vrot.lane.b32.xlu1 %v2515_v13, %s2637_s26 }
0x10c6   :  { %v1396_v58 = vpop.f32.mrf.mxu0 }
0x10c7   :  { %v1397_v62 = vadd.f32 %v3456_v42, %v1396_v58 }
0x10c8   :  { %v2313_v63 = vpop.f32.mrf.mxu0 }
0x10c9   :  { %2516 = vtanh.f32 %v1397_v62  ;;  %v1952_v21 = vmul.f32 -1.442695, %v1397_v62 }
0x10ca   :  { %2518 = vpow2.f32 %v1958_v18 }
0x10d6   :  { %v2517_v17 = vpop.eup %2516 }
0x10d7   :  { %1409 = vrot.lane.b32.xlu0 %v2517_v17, %s2639_s15  ;;  %v2519_v19 = vpop.eup %2518 }
0x10d8   :  { %v1528_v20 = vadd.f32 1.0, %v2519_v19 }
0x10da   :  { %2520 = vrcp.f32 %v1528_v20 }
0x10db   :  { %2522 = vpow2.f32 %v1952_v21 }
0x10e7   :  { %v2521_v5 = vpop.eup %2520 }
0x10f9   :  { %v1548_v6 = vpop.permute.xlu1 %1547 }
0x10fa   :  { %v1550_v7 = vmul.f32 %v2521_v5, %v1548_v6 }
0x10fc   :  { %1551 = vst.msk [vmem:[#allocation2] sm:$0xff] %vm79_vm1, %v1550_v7  ;;  %1963 = vmatmul.mubr.msk.f32.vlgmr.msra.gmra.mxu0 %vm79_vm1, %v1550_v7 }
0x10fd   :  { %2350 = vmatpush3.msra.mxu0 %v3302_v61  ;;  %2381 = vmatprep.mubr.msk.f32.mxu0 %vm2638_vm0, %v2636_v0  ;;  %v2523_v61 = vpop.eup %2522 }
0x10fe   :  { %2351 = vmatprep.subr.mxu0 %v2636_v0 }
0x10ff   :  { %2352 = vmatpush3.msra.mxu0 %v3311_v40  ;;  %v1403_v40 = vadd.f32 1.0, %v2523_v61  ;;  %v284_v61 = vld [vmem:[%s3578_s1] sm:$0xff] }
0x1100   :  { %2353 = vmatprep.subr.mxu0 %v2636_v0 }
0x1101   :  { %2354 = vmatpush3.msra.mxu0 %v3318_v25  ;;  %2524 = vrcp.f32 %v1403_v40 }
0x1102   :  { %2355 = vmatprep.subr.mxu0 %v2636_v0 }
0x1103   :  { %2356 = vmatpush3.msra.mxu0 %v3325_v30 }
0x1104   :  { %2357 = vmatprep.subr.mxu0 %v2636_v0 }
0x1105   :  { %2358 = vmatpush3.msra.mxu0 %v3332_v31 }
0x1106   :  { %2359 = vmatprep.subr.mxu0 %v2636_v0 }
0x1107   :  { %2360 = vmatpush3.msra.mxu0 %v3339_v32 }
0x1108   :  { %2361 = vmatprep.subr.mxu0 %v2636_v0 }
0x1109   :  { %2362 = vmatpush3.msra.mxu0 %v3346_v33 }
0x110a   :  { %2363 = vmatprep.subr.mxu0 %v2636_v0 }
0x110b   :  { %2364 = vmatpush3.msra.mxu0 %v3353_v34 }
0x110c   :  { %2365 = vmatprep.subr.mxu0 %v2636_v0 }
0x110d   :  { %2366 = vmatpush3.msra.mxu0 %v3360_v35 }
0x110e   :  { %2367 = vmatprep.subr.mxu0 %v2636_v0  ;;  %v2525_v25 = vpop.eup %2524 }
0x110f   :  { %2368 = vmatpush3.msra.mxu0 %v3367_v36  ;;  %v1407_v32 = vmul.f32 %v2525_v25, %v3414_v55  ;;  %v1962_v36 = vld [vmem:[%s3577_s0 + $0x78] sm:$0xff] }
0x1110   :  { %2369 = vmatprep.subr.mxu0 %v2636_v0 }
0x1111   :  { %2370 = vmatpush3.msra.mxu0 %v3374_v37 }
0x1112   :  { %2371 = vmatprep.subr.mxu0 %v2636_v0 }
0x1113   :  { %2372 = vmatpush3.msra.mxu0 %v3381_v38 }
0x1114   :  { %2373 = vmatprep.subr.mxu0 %v2636_v0 }
0x1115   :  { %2374 = vmatpush3.msra.mxu0 %v3388_v43 }
0x1116   :  { %2375 = vmatprep.subr.mxu0 %v2636_v0 }
0x1117   :  { %2376 = vmatpush3.msra.mxu0 %v3395_v44 }
0x1118   :  { %2377 = vmatprep.subr.mxu0 %v2636_v0 }
0x1119   :  { %2378 = vmatpush3.msra.mxu0 %v3402_v45 }
0x111a   :  { %2379 = vmatprep.subr.mxu0 %v2636_v0 }
0x111b   :  { %2380 = vmatpush3.msra.mxu0 %v3409_v46  ;;  %v1961_v46 = vld [vmem:[%s3577_s0 + $0x70] sm:$0xff] }
0x1149   :  { %v1410_v30 = vpop.permute.xlu0 %1409 }
0x114a   :  { %v1412_v31 = vmul.f32 %v2525_v25, %v1410_v30 }
0x114c   :  { %1414 = vrot.lane.b32.xlu0 %v1412_v31, %s2640_s18 }
0x11bc   :  { %v1742_v0 = vpop.f32.mrf.mxu0 }
0x11bd   :  { %v1747_v47 = vadd.f32 %v1961_v46, %v1742_v0  ;;  %v1925_v0 = vld [vmem:[%s3578_s1 + $0x8] sm:$0xff] }
0x11be   :  { %v1415_v33 = vpop.permute.xlu0 %1414  ;;  %v1744_v37 = vpop.f32.mrf.mxu0 }
0x11bf   :  { %v1417_v34 = vadd.f32 %v1415_v33, %v1407_v32  ;;  %v1748_v38 = vadd.f32 %v1962_v36, %v1744_v37  ;;  %v1964_v48 = vmul.f32 -1.442695, %v1747_v47  ;;  %v1932_v36 = vld [vmem:[%s3578_s1 + $0x10] sm:$0xff]  ;;  %v1939_v37 = vld [vmem:[%s3578_s1 + $0x18] sm:$0xff] }
0x11c1   :  { %2526 = vtanh.f32 %v1417_v34  ;;  %v1965_v24 = vmul.f32 -1.442695, %v1748_v38 }
0x11c2   :  { %2528 = vtanh.f32 %v1748_v38  ;;  %v1953_v38 = vld [vmem:[%s3578_s1 + $0x28] sm:$0xff] }
0x11c3   :  { %2530 = vpow2.f32 %v1964_v48 }
0x11ce   :  { %v2527_v35 = vpop.eup %2526 }
0x11cf   :  { %1420 = vrot.lane.b32.xlu0 %v2527_v35, %s2640_s18  ;;  %v2529_v45 = vpop.eup %2528 }
0x11d0   :  { %v2531_v56 = vpop.eup %2530 }
0x11d1   :  { %v1755_v50 = vadd.f32 1.0, %v2531_v56 }
0x11d3   :  { %2532 = vrcp.f32 %v1755_v50 }
0x11e0   :  { %v2533_v52 = vpop.eup %2532 }
0x11e1   :  { %v1762_v57 = vmul.f32 %v2533_v52, %v3449_v12 }
0x1241   :  { %v1421_v43 = vpop.permute.xlu0 %1420 }
0x1242   :  { %v3501_v44 = vmul.f32 %v2525_v25, %v1421_v43  ;;  %v1960_v43 = vld [vmem:[%s3578_s1 + $0x30] sm:$0xff] }
0x1244   :  { %1553 = vrot.lane.b32.xlu0 %v3501_v44, %s2641_s19 }
0x1248   :  { %1764 = vrot.lane.b32.xlu0 %v2529_v45, %s2637_s26  ;;  %v1967_v45 = vld [vmem:[%s3578_s1 + $0x38] sm:$0xff] }
0x12b6   :  { %v1554_v51 = vpop.permute.xlu0 %1553 }
0x12b7   :  { %1556 = vst.msk [vmem:[#allocation2] sm:$0xff] %vm187_vm2, %v1554_v51 }
0x12ba   :  { %v1765_v54 = vpop.permute.xlu0 %1764 }
0x12bb   :  { %v1767_v27 = vmul.f32 %v2533_v52, %v1765_v54 }
0x12bd   :  { %1769 = vrot.lane.b32.xlu0 %v1767_v27, %s2637_s26 }
0x12be   :  { %v1557_v55 = vld [vmem:[#allocation2] sm:$0xff] }
0x12bf   :  { %2347 = vmatmul.mubr.f32.vlgmr.msra.gmra.mxu1 %v1557_v55 }
0x132f   :  { %v1770_v2 = vpop.permute.xlu0 %1769 }
0x1330   :  { %v1772_v3 = vadd.f32 %v1770_v2, %v1762_v57 }
0x1332   :  { %2534 = vtanh.f32 %v1772_v3 }
0x133f   :  { %v2535_v4 = vpop.eup %2534 }
0x1340   :  { %1775 = vrot.lane.b32.xlu0 %v2535_v4, %s2637_s26 }
0x137f   :  { %v1624_v8 = vpop.f32.mrf.mxu1 }
0x1380   :  { %v1625_v9 = vadd.f32 %v3456_v42, %v1624_v8 }
0x1381   :  { %v2348_v39 = vpop.f32.mrf.mxu1 }
0x1382   :  { %2536 = vtanh.f32 %v1625_v9  ;;  %v1959_v16 = vmul.f32 -1.442695, %v1625_v9 }
0x1383   :  { %2538 = vpow2.f32 %v1965_v24 }
0x138f   :  { %v2537_v53 = vpop.eup %2536 }
0x1390   :  { %1637 = vrot.lane.b32.xlu1 %v2537_v53, %s2639_s15  ;;  %v2539_v26 = vpop.eup %2538 }
0x1391   :  { %v1756_v14 = vadd.f32 1.0, %v2539_v26 }
0x1393   :  { %2540 = vrcp.f32 %v1756_v14 }
0x1394   :  { %2542 = vpow2.f32 %v1959_v16 }
0x13a0   :  { %v2541_v15 = vpop.eup %2540 }
0x13a1   :  { %v2543_v59 = vpop.eup %2542 }
0x13a2   :  { %v1631_v29 = vadd.f32 1.0, %v2543_v59 }
0x13a4   :  { %2544 = vrcp.f32 %v1631_v29 }
0x13b1   :  { %v2545_v10 = vpop.eup %2544 }
0x13b2   :  { %v1776_v28 = vpop.permute.xlu0 %1775  ;;  %v1635_v13 = vmul.f32 %v2545_v10, %v1417_v34 }
0x13b3   :  { %v1778_v23 = vmul.f32 %v2541_v15, %v1776_v28 }
0x13b5   :  { %1779 = vst.msk [vmem:[#allocation2] sm:$0xff] %vm79_vm1, %v1778_v23 }
0x1402   :  { %v1638_v11 = vpop.permute.xlu1 %1637 }
0x1403   :  { %v1640_v12 = vmul.f32 %v2545_v10, %v1638_v11 }
0x1405   :  { %1642 = vrot.lane.b32.xlu1 %v1640_v12, %s2640_s18 }
0x1477   :  { %v1643_v58 = vpop.permute.xlu1 %1642 }
0x1478   :  { %v1645_v62 = vadd.f32 %v1643_v58, %v1635_v13 }
0x147a   :  { %2546 = vtanh.f32 %v1645_v62 }
0x1487   :  { %v2547_v63 = vpop.eup %2546 }
0x1488   :  { %1648 = vrot.lane.b32.xlu1 %v2547_v63, %s2640_s18 }
0x14fa   :  { %v1649_v18 = vpop.permute.xlu1 %1648 }
0x14fb   :  { %v3518_v17 = vmul.f32 %v2545_v10, %v1649_v18 }
0x14fd   :  { %1781 = vrot.lane.b32.xlu1 %v3518_v17, %s2641_s19 }
0x156f   :  { %v1782_v19 = vpop.permute.xlu1 %1781 }
0x1570   :  { %1784 = vst.msk [vmem:[#allocation2] sm:$0xff] %vm187_vm2, %v1782_v19 }
0x1577   :  { %v1785_v20 = vld [vmem:[#allocation2] sm:$0xff] }
0x1578   :  { %2382 = vmatmul.mubr.f32.vlgmr.msra.gmra.mxu0 %v1785_v20 }
0x1638   :  { %v1852_v5 = vpop.f32.mrf.mxu0 }
0x1639   :  { %v1853_v6 = vadd.f32 %v3456_v42, %v1852_v5 }
0x163a   :  { %v2383_v7 = vpop.f32.mrf.mxu0 }
0x163b   :  { %2548 = vtanh.f32 %v1853_v6  ;;  %v1966_v40 = vmul.f32 -1.442695, %v1853_v6 }
0x163d   :  { %2550 = vpow2.f32 %v1966_v40 }
0x1648   :  { %v2549_v21 = vpop.eup %2548 }
0x1649   :  { %1865 = vrot.lane.b32.xlu0 %v2549_v21, %s2639_s15  ;;  %s2643_s15 = smov 120  }
0x164a   :  { %v2551_v25 = vpop.eup %2550 }
0x164b   :  { %v1859_v30 = vadd.f32 1.0, %v2551_v25 }
0x164d   :  { %286 = vrot.lane.b32.xlu0 %v284_v61, %s2642_s7  ;;  %2552 = vrcp.f32 %v1859_v30 }
0x165a   :  { %v2553_v31 = vpop.eup %2552 }
0x165b   :  { %v1863_v46 = vmul.f32 %v2553_v31, %v1645_v62 }
0x16bb   :  { %v1866_v32 = vpop.permute.xlu0 %1865 }
0x16bc   :  { %v1868_v33 = vmul.f32 %v2553_v31, %v1866_v32 }
0x16be   :  { %1870 = vrot.lane.b32.xlu1 %v1868_v33, %s2640_s18 }
0x16bf   :  { %v287_v42 = vpop.permute.xlu0 %286 }
0x16c0   :  { %v289_v34 = vsub.f32 %v2965_v60, %v287_v42  ;;  %v1946_v60 = vld [vmem:[%s3578_s1 + $0x20] sm:$0xff]  ;;  %s2644_s1 = smov [#allocation6]  }
0x16c2   :  { %v290_v35 = vmul.f32 %v289_v34, %v289_v34 }
0x16c4   :  { %292 = vrot.lane.b32.xlu1 %v290_v35, %s2643_s15 }
0x16c8   :  { %515 = vrot.lane.b32.xlu1 %v1925_v0, %s2642_s7 }
0x16cc   :  { %743 = vrot.lane.b32.xlu1 %v1932_v36, %s2642_s7 }
0x16d0   :  { %971 = vrot.lane.b32.xlu1 %v1939_v37, %s2642_s7 }
0x16d4   :  { %1199 = vrot.lane.b32.xlu1 %v1946_v60, %s2642_s7 }
0x16d8   :  { %1427 = vrot.lane.b32.xlu1 %v1953_v38, %s2642_s7 }
0x16dc   :  { %1655 = vrot.lane.b32.xlu1 %v1960_v43, %s2642_s7 }
0x16e0   :  { %1883 = vrot.lane.b32.xlu1 %v1967_v45, %s2642_s7 }
0x1730   :  { %v1871_v47 = vpop.permute.xlu1 %1870 }
0x1731   :  { %v1873_v48 = vadd.f32 %v1871_v47, %v1863_v46 }
0x1733   :  { %2554 = vtanh.f32 %v1873_v48 }
0x1736   :  { %v293_v56 = vpop.permute.xlu1 %292 }
0x1737   :  { %v296_v50 = vsel %vm295_vm3, %v293_v56, 0.0 }
0x1738   :  { %297 = vadd.xlane.f32.xlu0 %v296_v50 }
0x173a   :  { %v516_v52 = vpop.permute.xlu1 %515 }
0x173b   :  { %v518_v54 = vsub.f32 %v3073_v41, %v516_v52 }
0x173d   :  { %v519_v55 = vmul.f32 %v518_v54, %v518_v54 }
0x173e   :  { %v744_v27 = vpop.permute.xlu1 %743 }
0x173f   :  { %v746_v57 = vsub.f32 %v3155_v1, %v744_v27 }
0x1740   :  { %v2555_v51 = vpop.eup %2554 }
0x1741   :  { %1876 = vrot.lane.b32.xlu1 %v2555_v51, %s2640_s18  ;;  %v747_v2 = vmul.f32 %v746_v57, %v746_v57  ;;  %s1906_s18 = sshll.u32 %s2644_s1, 4  ;;  %s1907_s18 = int_to_ptr.vmem [resolvable:$true] %s1906_s18 }
0x1742   :  { %v972_v3 = vpop.permute.xlu1 %971  ;;  %s2609_s3 = scalar_lea.vmem %s1907_s18, 128  ;;  %p2614_p6 = scmp.lt.s32.totalorder %s1907_s18, %s1907_s18 }
0x1743   :  { %v974_v1 = vsub.f32 %v3257_v49, %v972_v3  ;;  %p2610_p5 = scmp.ne.s32.totalorder %s1907_s18, %s2609_s3  ;;  %p2615_p7 = scmp.lt.s32.totalorder %s2609_s3, %s2609_s3 }
0x1745   :  { %v975_v15 = vmul.f32 %v974_v1, %v974_v1  ;;  %p2616_p8 = por %p2615_p7, %p2614_p6 }
0x1746   :  { %v1200_v4 = vpop.permute.xlu1 %1199 }
0x1747   :  { %v1202_v28 = vsub.f32 %v3421_v22, %v1200_v4  ;;  %v74_v22 = vlaneseq  ;;  %p2617_p9 = pnand %p2616_p8, %p2610_p5 }
0x1749   :  { %v1203_v16 = vmul.f32 %v1202_v28, %v1202_v28  ;;  %v75_v58 = vand.u32 127, %v74_v22 }
0x174a   :  { %v1428_v24 = vpop.permute.xlu1 %1427 }
0x174b   :  { %v1430_v10 = vsub.f32 %v3501_v44, %v1428_v24  ;;  %vm300_vm4 = vcmp.eq.s32.totalorder %v75_v58, 0  ;;  %vm528_vm5 = vcmp.eq.s32.totalorder %v75_v58, 1  ;;  %vm756_vm6 = vcmp.eq.s32.totalorder %v75_v58, 2 }
0x174c   :  { %vm984_vm7 = vcmp.eq.s32.totalorder %v75_v58, 3  ;;  %vm1212_vm8 = vcmp.eq.s32.totalorder %v75_v58, 4  ;;  %vm1440_vm9 = vcmp.eq.s32.totalorder %v75_v58, 5  ;;  %vm1668_vm10 = vcmp.eq.s32.totalorder %v75_v58, 6 }
0x174d   :  { %v1431_v13 = vmul.f32 %v1430_v10, %v1430_v10  ;;  %vm1896_vm11 = vcmp.eq.s32.totalorder %v75_v58, 7 }
0x174e   :  { %521 = vrot.lane.b32.xlu0 %v519_v55, %s2643_s15  ;;  %v1656_v26 = vpop.permute.xlu1 %1655 }
0x174f   :  { %v1658_v59 = vsub.f32 %v3518_v17, %v1656_v26 }
0x1751   :  { %v1659_v11 = vmul.f32 %v1658_v59, %v1658_v59 }
0x1752   :  { %749 = vrot.lane.b32.xlu0 %v747_v2, %s2643_s15  ;;  %v1884_v14 = vpop.permute.xlu1 %1883 }
0x17b3   :  { %v1877_v23 = vpop.permute.xlu1 %1876 }
0x17b4   :  { %v1879_v29 = vmul.f32 %v2553_v31, %v1877_v23 }
0x17b6   :  { %v1886_v12 = vsub.f32 %v1879_v29, %v1884_v14 }
0x17b8   :  { %v1887_v49 = vmul.f32 %v1886_v12, %v1886_v12 }
0x17c1   :  { %v298_v8 = vpop.xlane.xlu0 %297 }
0x17c2   :  { %v299_v62 = vmul.f32 0.25, %v298_v8 }
0x17c4   :  { %v301_v44 = vsel %vm300_vm4, %v299_v62, 0.0 }
0x17c5   :  { %v522_v9 = vpop.permute.xlu0 %521 }
0x17c6   :  { %v524_v39 = vsel %vm295_vm3, %v522_v9, 0.0 }
0x17c7   :  { %525 = vadd.xlane.f32.xlu1 %v524_v39 }
0x17c9   :  { %v750_v53 = vpop.permute.xlu0 %749 }
0x17ca   :  { %v752_v41 = vsel %vm295_vm3, %v750_v53, 0.0 }
0x17cb   :  { %753 = vadd.xlane.f32.xlu0 %v752_v41 }
0x17d8   :  { %977 = vrot.lane.b32.xlu1 %v975_v15, %s2643_s15 }
0x17dc   :  { %1205 = vrot.lane.b32.xlu1 %v1203_v16, %s2643_s15 }
0x17e0   :  { %1661 = vrot.lane.b32.xlu1 %v1659_v11, %s2643_s15 }
0x17e1   :  { %1433 = vrot.lane.b32.xlu0 %v1431_v13, %s2643_s15 }
0x17e4   :  { %1889 = vrot.lane.b32.xlu1 %v1887_v49, %s2643_s15 }
0x1850   :  { %v526_v63 = vpop.xlane.xlu1 %525 }
0x1851   :  { %v527_v18 = vmul.f32 0.25, %v526_v63 }
0x1853   :  { %v529_v17 = vsel %vm528_vm5, %v527_v18, %v301_v44 }
0x1854   :  { %v754_v19 = vpop.xlane.xlu0 %753  ;;  %v978_v20 = vpop.permute.xlu1 %977 }
0x1855   :  { %v755_v5 = vmul.f32 0.25, %v754_v19  ;;  %v980_v6 = vsel %vm295_vm3, %v978_v20, 0.0 }
0x1856   :  { %981 = vadd.xlane.f32.xlu1 %v980_v6 }
0x1857   :  { %v757_v7 = vsel %vm756_vm6, %v755_v5, %v529_v17 }
0x1858   :  { %v1434_v21 = vpop.permute.xlu0 %1433  ;;  %v1206_v61 = vpop.permute.xlu1 %1205 }
0x1859   :  { %v1436_v40 = vsel %vm295_vm3, %v1434_v21, 0.0  ;;  %v1208_v25 = vsel %vm295_vm3, %v1206_v61, 0.0 }
0x185a   :  { %1437 = vadd.xlane.f32.xlu1 %v1436_v40  ;;  %1209 = vadd.xlane.f32.xlu0 %v1208_v25 }
0x185c   :  { %v1662_v30 = vpop.permute.xlu1 %1661 }
0x185d   :  { %v1664_v31 = vsel %vm295_vm3, %v1662_v30, 0.0 }
0x185e   :  { %1665 = vadd.xlane.f32.xlu1 %v1664_v31 }
0x1860   :  { %v1890_v32 = vpop.permute.xlu1 %1889 }
0x1861   :  { %v1892_v33 = vsel %vm295_vm3, %v1890_v32, 0.0 }
0x1862   :  { %1893 = vadd.xlane.f32.xlu0 %v1892_v33 }
0x18df   :  { %v982_v42 = vpop.xlane.xlu1 %981 }
0x18e0   :  { %v983_v0 = vmul.f32 0.25, %v982_v42 }
0x18e2   :  { %v985_v60 = vsel %vm984_vm7, %v983_v0, %v757_v7 }
0x18e3   :  { %v1210_v34 = vpop.xlane.xlu0 %1209  ;;  %v1438_v35 = vpop.xlane.xlu1 %1437 }
0x18e4   :  { %v1211_v36 = vmul.f32 0.25, %v1210_v34  ;;  %v1439_v38 = vmul.f32 0.25, %v1438_v35 }
0x18e6   :  { %v1213_v43 = vsel %vm1212_vm8, %v1211_v36, %v985_v60 }
0x18e7   :  { %v1666_v37 = vpop.xlane.xlu1 %1665  ;;  %v1441_v47 = vsel %vm1440_vm9, %v1439_v38, %v1213_v43 }
0x18e8   :  { %v1667_v45 = vmul.f32 0.25, %v1666_v37 }
0x18ea   :  { %v1669_v56 = vsel %vm1668_vm10, %v1667_v45, %v1441_v47 }
0x18eb   :  { %v1894_v46 = vpop.xlane.xlu0 %1893 }
0x18ec   :  { %v1895_v48 = vmul.f32 0.25, %v1894_v46 }
0x18ee   :  { %v1897_v50 = vsel %vm1896_vm11, %v1895_v48, %v1669_v56 }
0x18ef   :  { %1899 = vst.msk [vmem:[#allocation6] sm:$0xff] %vm1898_vm12, %v1897_v50 }
0x18f0   :  { %2620 = shalt.err (!%p2617_p9)
}
0x18f1   :  { %1909 = dma.vmem_to_hbm [thread:$0]  %s1907_s18, 128, %s3582_s5, [#allocation5]  }
0x18f2   :  { %2631 = dma.done.wait [#allocation5], 128  }
0x18f3   :  { %2632 = vsyncadd [#allocation5], 4294967168 }
0x18f4   :  { %1913 = vsyncpa [#allocation4], 1 }
0x18f5   :  { %1914 = vsyncpa [#allocation5], 1 }

</bundles_post_ra>
